<compile_context>
chip_gen: v6e
topology: v6e:2x2x1
jax: 0.10.0
libtpu: 0.0.40
codegen_flags: <defaults>
</compile_context>

<pallas_src>
import functools

import jax
import jax.numpy as jnp
from jax import lax
from jax.experimental import pallas as pl
from jax.experimental.pallas import tpu as pltpu

_PREC = jax.lax.Precision.HIGHEST        # f32-accurate MXU passes (MXU is idle here)


def _dot(a, b):
    return jnp.dot(a, b, precision=_PREC, preferred_element_type=jnp.float32)


# ---------------------------------------------------------------------------
# 3x3 conv (padding=1) over lane-packed images, as ONE dot.
#   inp:     (C_in, N)        N = Bt * H * W   (Bt images packed along lanes)
#   w_stack: (C_out, 9*C_in)  column index = (ky*3+kx)*C_in + i
#   mask:    (9*C_in, N)      1.0 where the shifted neighbour is a valid pixel
# Each tap is a lane roll (XLU); the 9 taps are concatenated along sublanes,
# masked with a single multiply and contracted with a single MXU dot.
# ---------------------------------------------------------------------------
def _conv3x3_fused(inp, w_stack, mask, width):
    n = inp.shape[-1]
    taps = []
    for t in range(9):
        dy, dx = t // 3 - 1, t % 3 - 1
        k = dy * width + dx                       # flat-lane offset of this tap
        taps.append(inp if k == 0 else pltpu.roll(inp, shift=(-k) % n, axis=1))
    stacked = jnp.concatenate(taps, axis=0) * mask          # one mask multiply
    return _dot(w_stack, stacked)                           # one MXU dot


# ---------------------------------------------------------------------------
# Fused SpeD kernel: one grid step handles a block of Bt images in VMEM.
# ---------------------------------------------------------------------------
def _sped_kernel(x_ref, z_ref, mx_ref, mz_ref, pool_ref, bcast_ref,
                 wconv_ref, wmix_ref, bias_ref, out_ref,
                 *, C, c, width_x, width_z):
    x = x_ref[...]                               # (C, Nx)   Nx = Bt*Hx*Wx
    z = z_ref[...]                               # (c, Nz)   Nz = Bt*Hz*Wz

    # --- consolidated weights: static slices of 3 packed operands ----------
    w_dw = wconv_ref[0:C, :]                     # (C, 9C)  dwconv taps
    w_zd = wconv_ref[C:2 * C, :]                 # (C, 9C)  z_depthwise taps
    w_lin = wmix_ref[0:C, 0:C]                   # (C, C)   wx_linear
    w_exp = wmix_ref[C:C + c, 0:C]               # (c, C)   wx_expand
    w_z1 = wmix_ref[C + c:2 * C + c, 0:c]        # (C, c)   z_conv1 (1x1)
    w_fc = wmix_ref[2 * C + c:3 * C + c, 0:c]    # (C, c)   final_conv (1x1)
    b_dw = bias_ref[0:C, 0:1]
    b_lin = bias_ref[0:C, 1:2]
    b_exp = bias_ref[0:c, 2:3]
    b_z1 = bias_ref[0:C, 3:4]
    b_zd = bias_ref[0:C, 4:5]
    b_fc = bias_ref[0:C, 5:6]

    # --- x path: Conv3x3 -> ReLU -> global avg pool -> Linear+Sigmoid -> Linear
    conv_x = jnp.maximum(
        _conv3x3_fused(x, w_dw, mx_ref[...], width_x) + b_dw, 0.0)
    pooled = _dot(conv_x, pool_ref[...])         # (C, Bt) per-image mean (MXU)
    pre = _dot(w_lin, pooled) + b_lin
    wx = 1.0 / (1.0 + jnp.exp(-pre))             # (C, Bt)  sigmoid
    wxe = _dot(w_exp, wx) + b_exp                # (c, Bt)

    # broadcast the per-image scalars back over the packed lanes of z (MXU)
    bcast = bcast_ref[...]                       # (Bt, Nz) 0/1 selector
    wxe_b = _dot(wxe, bcast)                     # (c, Nz)
    wx_b = _dot(wx, bcast)                       # (C, Nz)

    # --- z path: (z*wxe) -> 1x1 conv+ReLU -> 3x3 conv+ReLU -> *wx -> +1x1(z)
    zc = jnp.maximum(_dot(w_z1, z * wxe_b) + b_z1, 0.0)     # (C, Nz)
    zp = jnp.maximum(
        _conv3x3_fused(zc, w_zd, mz_ref[...], width_z) + b_zd, 0.0)
    out_ref[...] = _dot(w_fc, z) + b_fc + zp * wx_b


# ---------------------------------------------------------------------------
# Wrapper helpers
# ---------------------------------------------------------------------------
def _expanded_masks(h, w, n_chan, bt):
    """(9*n_chan, bt*h*w) validity mask matching the tap-stacked conv operand."""
    hw = h * w
    yy = jnp.arange(hw, dtype=jnp.int32) // w
    xx = jnp.arange(hw, dtype=jnp.int32) % w
    rows = []
    for t in range(9):
        dy, dx = t // 3 - 1, t % 3 - 1
        ok = ((yy + dy >= 0) & (yy + dy < h) & (xx + dx >= 0) & (xx + dx < w))
        rows.append(ok.astype(jnp.float32))
    m = jnp.stack(rows, axis=0)                  # (9, hw)
    m = jnp.repeat(m, n_chan, axis=0)            # (9*C, hw) rows = tap*C + chan
    return jnp.tile(m, (1, bt))                  # (9*C, bt*hw)


def _stack_taps(w):
    """Conv2d weight (O, I, 3, 3) -> (O, 9*I), column = (ky*3+kx)*I + i."""
    o, i = w.shape[0], w.shape[1]
    return jnp.transpose(w, (0, 2, 3, 1)).reshape(o, 9 * i)


def sped_forward_pallas(z_nchw, x_nchw, params, *, num_steps=None):
    B, C, H, W = x_nchw.shape
    _, c, Hz, Wz = z_nchw.shape
    HWx, HWz = H * W, Hz * Wz

    # Grid sizing: >=2 steps keeps both v7x TensorCores busy; on single-TC
    # v5e/v6e the extra tiny step costs ~0.35us.  Each step handles Bt images.
    if num_steps is None:
        num_steps = min(B, 2)
    Bt = pl.cdiv(B, num_steps)
    Bpad = Bt * num_steps
    Nx, Nz = Bt * HWx, Bt * HWz

    f32 = lambda a: jnp.asarray(a, jnp.float32)
    x2, z2 = f32(x_nchw), f32(z_nchw)
    if Bpad != B:
        x2 = jnp.pad(x2, ((0, Bpad - B), (0, 0), (0, 0), (0, 0)))
        z2 = jnp.pad(z2, ((0, Bpad - B), (0, 0), (0, 0), (0, 0)))

    # Lane-pack Bt images per grid step: (step, C, Bt*H*W) slabs (layout
    # plumbing done once in the wrapper; kernel I/O is fully lane-dense).
    # TODO(synk): for large HBM-bound batches, keep these slabs bf16 and cast
    # to f32 inside the kernel to halve DMA bytes.
    xp = (x2.reshape(num_steps, Bt, C, HWx)
            .transpose(0, 2, 1, 3).reshape(num_steps, C, Nx))
    zp = (z2.reshape(num_steps, Bt, c, HWz)
            .transpose(0, 2, 1, 3).reshape(num_steps, c, Nz))

    # Border masks for the tap-stacked conv operands (also zero the positions
    # where a roll would wrap between packed images).
    mx = _expanded_masks(H, W, C, Bt)            # (9C, Nx)
    mz = _expanded_masks(Hz, Wz, C, Bt)          # (9C, Nz)

    # Per-image mean-pool / lane-broadcast selector matrices (MXU-friendly).
    img_x = jnp.arange(Nx, dtype=jnp.int32) // HWx
    pool_x = (img_x[:, None] == jnp.arange(Bt)[None, :]).astype(jnp.float32) / HWx
    img_z = jnp.arange(Nz, dtype=jnp.int32) // HWz
    bcast_z = (jnp.arange(Bt)[:, None] == img_z[None, :]).astype(jnp.float32)

    # Consolidated weights: 3 operands instead of 12.
    cmax = max(C, c)
    w_conv = jnp.concatenate(
        [_stack_taps(f32(params['w_dw'])), _stack_taps(f32(params['w_zd']))],
        axis=0)                                                      # (2C, 9C)

    def pad2(w, rows, cols):
        return jnp.pad(w, ((0, rows - w.shape[0]), (0, cols - w.shape[1])))

    w_mix = jnp.concatenate([
        pad2(f32(params['w_lin']), C, cmax),
        pad2(f32(params['w_exp']), c, cmax),
        pad2(f32(params['w_z1'][:, :, 0, 0]), C, cmax),
        pad2(f32(params['w_fc'][:, :, 0, 0]), C, cmax)], axis=0)     # (3C+c, cmax)

    def pad1(b):
        b = f32(b)
        return jnp.pad(b, (0, cmax - b.shape[0]))

    biases = jnp.stack([pad1(params['b_dw']), pad1(params['b_lin']),
                        pad1(params['b_exp']), pad1(params['b_z1']),
                        pad1(params['b_zd']), pad1(params['b_fc'])],
                       axis=1)                                       # (cmax, 6)

    kernel = functools.partial(_sped_kernel, C=C, c=c, width_x=W, width_z=Wz)

    def const_spec(shape):
        nd = len(shape)
        return pl.BlockSpec(shape, lambda g, nd=nd: (0,) * nd)

    out = pl.pallas_call(
        kernel,
        out_shape=jax.ShapeDtypeStruct((num_steps, C, Nz), jnp.float32),
        grid=(num_steps,),
        in_specs=[
            pl.BlockSpec((None, C, Nx), lambda g: (g, 0, 0)),   # x block
            pl.BlockSpec((None, c, Nz), lambda g: (g, 0, 0)),   # z block
            const_spec((9 * C, Nx)),                            # mx
            const_spec((9 * C, Nz)),                            # mz
            const_spec((Nx, Bt)),                               # pool matrix
            const_spec((Bt, Nz)),                               # broadcast matrix
            const_spec((2 * C, 9 * C)),                         # conv taps
            const_spec((3 * C + c, cmax)),                      # channel-mix mats
            const_spec((cmax, 6)),                              # biases
        ],
        out_specs=pl.BlockSpec((None, C, Nz), lambda g: (g, 0, 0)),
        compiler_params=pltpu.CompilerParams(
            dimension_semantics=("parallel",)),                 # 2 TCs on v7x
    )(xp, zp, mx, mz, pool_x, bcast_z, w_conv, w_mix, biases)

    out = (out.reshape(num_steps, C, Bt, HWz)
              .transpose(0, 2, 1, 3).reshape(Bpad, C, Hz, Wz))
    return out[:B]                                               # NCHW output


# ---------------------------------------------------------------------------
# Pure-JAX reference (mirrors the PyTorch module, NCHW) for correctness check
# ---------------------------------------------------------------------------
def _conv_nchw(x, w, b, pad):
    y = lax.conv_general_dilated(
        x, w, window_strides=(1, 1), padding=[(pad, pad), (pad, pad)],
        dimension_numbers=('NCHW', 'OIHW', 'NCHW'), precision=_PREC)
    return y + b.reshape(1, -1, 1, 1)


def sped_forward_reference(z, x, p):
    xp = jnp.maximum(_conv_nchw(x, p['w_dw'], p['b_dw'], 1), 0.0)
    xp = jnp.mean(xp, axis=(2, 3))                       # AdaptiveAvgPool2d((1,1))
    wx = jax.nn.sigmoid(jnp.dot(xp, p['w_lin'].T, precision=_PREC) + p['b_lin'])
    wxe = jnp.dot(wx, p['w_exp'].T, precision=_PREC) + p['b_exp']
    zw = z * wxe[:, :, None, None]
    zc = jnp.maximum(_conv_nchw(zw, p['w_z1'], p['b_z1'], 0), 0.0)
    zpp = jnp.maximum(_conv_nchw(zc, p['w_zd'], p['b_zd'], 1), 0.0)
    out = zpp * wx[:, :, None, None]
    return _conv_nchw(z, p['w_fc'], p['b_fc'], 0) + out


if __name__ == "__main__":
    inband, outband = 4, 8
    B, H, W = 2, 16, 16

    key = jax.random.PRNGKey(0)
    ks = jax.random.split(key, 14)

    def u(k, shape, scale=0.2):
        return jax.random.uniform(k, shape, jnp.float32, -scale, scale)

    params = {
        'w_dw': u(ks[0], (inband, inband, 3, 3)),    # dwconv Conv2d(C,C,3,p=1)
        'b_dw': u(ks[1], (inband,)),
        'w_lin': u(ks[2], (inband, inband)),         # wx_linear Linear(C,C)
        'b_lin': u(ks[3], (inband,)),
        'w_exp': u(ks[4], (outband, inband)),        # wx_expand Linear(C,c)
        'b_exp': u(ks[5], (outband,)),
        'w_z1': u(ks[6], (inband, outband, 1, 1)),   # z_conv1 Conv2d(c,C,1)
        'b_z1': u(ks[7], (inband,)),
        'w_zd': u(ks[8], (inband, inband, 3, 3)),    # z_depthwise Conv2d(C,C,3,p=1)
        'b_zd': u(ks[9], (inband,)),
        'w_fc': u(ks[10], (inband, outband, 1, 1)),  # final_conv Conv2d(c,C,1)
        'b_fc': u(ks[11], (inband,)),
    }

    x = jax.random.normal(ks[12], (B, inband, H, W), jnp.float32)   # PyTorch NCHW
    z = jax.random.normal(ks[13], (B, outband, H, W), jnp.float32)  # PyTorch NCHW

    out = sped_forward_pallas(z, x, params)
    out = jax.block_until_ready(out)

    ref = sped_forward_reference(z, x, params)
    assert out.shape == (B, inband, H, W), out.shape
    max_err = float(jnp.max(jnp.abs(out - ref)))
    assert jnp.allclose(out, ref, rtol=5e-3, atol=5e-3), max_err
    print("KERNEL_OK")
</pallas_src>

<mosaic_0001>
module attributes {stable_mosaic.version = 11 : i64} {
  func.func @_sped_kernel(%arg0: i32, %arg1: memref<1x4x256xf32, #tpu.memory_space<vmem>>, %arg2: memref<1x8x256xf32, #tpu.memory_space<vmem>>, %arg3: memref<36x256xf32, #tpu.memory_space<vmem>>, %arg4: memref<36x256xf32, #tpu.memory_space<vmem>>, %arg5: memref<256x1xf32, #tpu.memory_space<vmem>>, %arg6: memref<1x256xf32, #tpu.memory_space<vmem>>, %arg7: memref<8x36xf32, #tpu.memory_space<vmem>>, %arg8: memref<20x8xf32, #tpu.memory_space<vmem>>, %arg9: memref<8x6xf32, #tpu.memory_space<vmem>>, %arg10: memref<1x4x256xf32, #tpu.memory_space<vmem>>) attributes {dimension_semantics = [#tpu.dimension_semantics<parallel>], iteration_bounds = array<i64: 2>, scalar_prefetch = 0 : i64, scratch_operands = 0 : i64, tpu.core_type = #tpu.core_type<tc>, window_params = [{transform_indices = @transform_0, window_bounds = array<i64: 1, 4, 256>}, {transform_indices = @transform_1, window_bounds = array<i64: 1, 8, 256>}, {pipeline_mode = #tpu.pipeline_mode<synchronous>, transform_indices = @transform_2, window_bounds = array<i64: 36, 256>}, {pipeline_mode = #tpu.pipeline_mode<synchronous>, transform_indices = @transform_3, window_bounds = array<i64: 36, 256>}, {pipeline_mode = #tpu.pipeline_mode<synchronous>, transform_indices = @transform_4, window_bounds = array<i64: 256, 1>}, {pipeline_mode = #tpu.pipeline_mode<synchronous>, transform_indices = @transform_5, window_bounds = array<i64: 1, 256>}, {pipeline_mode = #tpu.pipeline_mode<synchronous>, transform_indices = @transform_6, window_bounds = array<i64: 8, 36>}, {pipeline_mode = #tpu.pipeline_mode<synchronous>, transform_indices = @transform_7, window_bounds = array<i64: 20, 8>}, {pipeline_mode = #tpu.pipeline_mode<synchronous>, transform_indices = @transform_8, window_bounds = array<i64: 8, 6>}, {transform_indices = @transform_9, window_bounds = array<i64: 1, 4, 256>}]} {
    %c0 = arith.constant 0 : index
    %c0_0 = arith.constant 0 : index
    %c0_1 = arith.constant 0 : index
    %0 = vector.load %arg1[%c0, %c0_0, %c0_1] : memref<1x4x256xf32, #tpu.memory_space<vmem>>, vector<1x4x256xf32>
    %1 = vector.shape_cast %0 : vector<1x4x256xf32> to vector<4x256xf32>
    %c0_2 = arith.constant 0 : index
    %c0_3 = arith.constant 0 : index
    %c0_4 = arith.constant 0 : index
    %2 = vector.load %arg2[%c0_2, %c0_3, %c0_4] : memref<1x8x256xf32, #tpu.memory_space<vmem>>, vector<1x8x256xf32>
    %3 = vector.shape_cast %2 : vector<1x8x256xf32> to vector<8x256xf32>
    %c0_5 = arith.constant 0 : index
    %c0_6 = arith.constant 0 : index
    %4 = vector.load %arg7[%c0_5, %c0_6] : memref<8x36xf32, #tpu.memory_space<vmem>>, vector<4x36xf32>
    %c4 = arith.constant 4 : index
    %c0_7 = arith.constant 0 : index
    %5 = vector.load %arg7[%c4, %c0_7] : memref<8x36xf32, #tpu.memory_space<vmem>>, vector<4x36xf32>
    %c0_8 = arith.constant 0 : index
    %c0_9 = arith.constant 0 : index
    %6 = vector.load %arg8[%c0_8, %c0_9] : memref<20x8xf32, #tpu.memory_space<vmem>>, vector<4x4xf32>
    %c4_10 = arith.constant 4 : index
    %c0_11 = arith.constant 0 : index
    %7 = vector.load %arg8[%c4_10, %c0_11] : memref<20x8xf32, #tpu.memory_space<vmem>>, vector<8x4xf32>
    %c12 = arith.constant 12 : index
    %c0_12 = arith.constant 0 : index
    %8 = vector.load %arg8[%c12, %c0_12] : memref<20x8xf32, #tpu.memory_space<vmem>>, vector<4x8xf32>
    %c16 = arith.constant 16 : index
    %c0_13 = arith.constant 0 : index
    %9 = vector.load %arg8[%c16, %c0_13] : memref<20x8xf32, #tpu.memory_space<vmem>>, vector<4x8xf32>
    %c0_14 = arith.constant 0 : index
    %c0_15 = arith.constant 0 : index
    %10 = vector.load %arg9[%c0_14, %c0_15] : memref<8x6xf32, #tpu.memory_space<vmem>>, vector<4x1xf32>
    %c0_16 = arith.constant 0 : index
    %c1 = arith.constant 1 : index
    %11 = vector.load %arg9[%c0_16, %c1] : memref<8x6xf32, #tpu.memory_space<vmem>>, vector<4x1xf32>
    %c0_17 = arith.constant 0 : index
    %c2 = arith.constant 2 : index
    %12 = vector.load %arg9[%c0_17, %c2] : memref<8x6xf32, #tpu.memory_space<vmem>>, vector<8x1xf32>
    %c0_18 = arith.constant 0 : index
    %c3 = arith.constant 3 : index
    %13 = vector.load %arg9[%c0_18, %c3] : memref<8x6xf32, #tpu.memory_space<vmem>>, vector<4x1xf32>
    %c0_19 = arith.constant 0 : index
    %c4_20 = arith.constant 4 : index
    %14 = vector.load %arg9[%c0_19, %c4_20] : memref<8x6xf32, #tpu.memory_space<vmem>>, vector<4x1xf32>
    %c0_21 = arith.constant 0 : index
    %c5 = arith.constant 5 : index
    %15 = vector.load %arg9[%c0_21, %c5] : memref<8x6xf32, #tpu.memory_space<vmem>>, vector<4x1xf32>
    %c0_22 = arith.constant 0 : index
    %c0_23 = arith.constant 0 : index
    %16 = vector.load %arg3[%c0_22, %c0_23] : memref<36x256xf32, #tpu.memory_space<vmem>>, vector<36x256xf32>
    %c17_i32 = arith.constant 17 : i32
    %17 = tpu.dynamic_rotate %1 by %c17_i32 dim 1 : vector<4x256xf32>, i32 -> vector<4x256xf32>
    %c16_i32 = arith.constant 16 : i32
    %18 = tpu.dynamic_rotate %1 by %c16_i32 dim 1 : vector<4x256xf32>, i32 -> vector<4x256xf32>
    %c15_i32 = arith.constant 15 : i32
    %19 = tpu.dynamic_rotate %1 by %c15_i32 dim 1 : vector<4x256xf32>, i32 -> vector<4x256xf32>
    %c1_i32 = arith.constant 1 : i32
    %20 = tpu.dynamic_rotate %1 by %c1_i32 dim 1 : vector<4x256xf32>, i32 -> vector<4x256xf32>
    %c255_i32 = arith.constant 255 : i32
    %21 = tpu.dynamic_rotate %1 by %c255_i32 dim 1 : vector<4x256xf32>, i32 -> vector<4x256xf32>
    %c241_i32 = arith.constant 241 : i32
    %22 = tpu.dynamic_rotate %1 by %c241_i32 dim 1 : vector<4x256xf32>, i32 -> vector<4x256xf32>
    %c240_i32 = arith.constant 240 : i32
    %23 = tpu.dynamic_rotate %1 by %c240_i32 dim 1 : vector<4x256xf32>, i32 -> vector<4x256xf32>
    %c239_i32 = arith.constant 239 : i32
    %24 = tpu.dynamic_rotate %1 by %c239_i32 dim 1 : vector<4x256xf32>, i32 -> vector<4x256xf32>
    %25 = tpu.concatenate %17, %18, %19, %20, %1, %21, %22, %23, %24 in 0 : vector<4x256xf32>, vector<4x256xf32>, vector<4x256xf32>, vector<4x256xf32>, vector<4x256xf32>, vector<4x256xf32>, vector<4x256xf32>, vector<4x256xf32>, vector<4x256xf32> -> vector<36x256xf32>
    %26 = arith.mulf %25, %16 : vector<36x256xf32>
    %cst = arith.constant dense<0.000000e+00> : vector<4x256xf32>
    %27 = tpu.matmul %4, %26, %cst {dimension_numbers = #tpu.dot_dimension_numbers<[1], [0], [0], [1], [0, 0, 1, 1], [], []>, precision = #tpu.contract_precision<fp32>} : vector<4x36xf32>, vector<36x256xf32>, vector<4x256xf32> -> vector<4x256xf32>
    %28 = vector.broadcast %10 : vector<4x1xf32> to vector<4x256xf32>
    %29 = arith.addf %27, %28 : vector<4x256xf32>
    %cst_24 = arith.constant 0.000000e+00 : f32
    %30 = vector.broadcast %cst_24 : f32 to vector<4x256xf32>
    %31 = arith.maximumf %29, %30 : vector<4x256xf32>
    %c0_25 = arith.constant 0 : index
    %c0_26 = arith.constant 0 : index
    %32 = vector.load %arg5[%c0_25, %c0_26] : memref<256x1xf32, #tpu.memory_space<vmem>>, vector<256x1xf32>
    %cst_27 = arith.constant dense<0.000000e+00> : vector<4x1xf32>
    %33 = tpu.matmul %31, %32, %cst_27 {dimension_numbers = #tpu.dot_dimension_numbers<[1], [0], [0], [1], [0, 0, 1, 1], [], []>, precision = #tpu.contract_precision<fp32>} : vector<4x256xf32>, vector<256x1xf32>, vector<4x1xf32> -> vector<4x1xf32>
    %cst_28 = arith.constant dense<0.000000e+00> : vector<4x1xf32>
    %34 = tpu.matmul %6, %33, %cst_28 {dimension_numbers = #tpu.dot_dimension_numbers<[1], [0], [0], [1], [0, 0, 1, 1], [], []>, precision = #tpu.contract_precision<fp32>} : vector<4x4xf32>, vector<4x1xf32>, vector<4x1xf32> -> vector<4x1xf32>
    %35 = arith.addf %34, %11 : vector<4x1xf32>
    %cst_29 = arith.constant 0.000000e+00 : f32
    %36 = vector.broadcast %cst_29 : f32 to vector<4x1xf32>
    %37 = arith.subf %36, %35 : vector<4x1xf32>
    %38 = math.exp %37 : vector<4x1xf32>
    %cst_30 = arith.constant 1.000000e+00 : f32
    %39 = vector.broadcast %cst_30 : f32 to vector<4x1xf32>
    %40 = arith.addf %39, %38 : vector<4x1xf32>
    %cst_31 = arith.constant 1.000000e+00 : f32
    %41 = vector.broadcast %cst_31 : f32 to vector<4x1xf32>
    %42 = arith.divf %41, %40 : vector<4x1xf32>
    %cst_32 = arith.constant dense<0.000000e+00> : vector<8x1xf32>
    %43 = tpu.matmul %7, %42, %cst_32 {dimension_numbers = #tpu.dot_dimension_numbers<[1], [0], [0], [1], [0, 0, 1, 1], [], []>, precision = #tpu.contract_precision<fp32>} : vector<8x4xf32>, vector<4x1xf32>, vector<8x1xf32> -> vector<8x1xf32>
    %44 = arith.addf %43, %12 : vector<8x1xf32>
    %c0_33 = arith.constant 0 : index
    %c0_34 = arith.constant 0 : index
    %45 = vector.load %arg6[%c0_33, %c0_34] : memref<1x256xf32, #tpu.memory_space<vmem>>, vector<1x256xf32>
    %cst_35 = arith.constant dense<0.000000e+00> : vector<8x256xf32>
    %46 = tpu.matmul %44, %45, %cst_35 {dimension_numbers = #tpu.dot_dimension_numbers<[1], [0], [0], [1], [0, 0, 1, 1], [], []>, precision = #tpu.contract_precision<fp32>} : vector<8x1xf32>, vector<1x256xf32>, vector<8x256xf32> -> vector<8x256xf32>
    %cst_36 = arith.constant dense<0.000000e+00> : vector<4x256xf32>
    %47 = tpu.matmul %42, %45, %cst_36 {dimension_numbers = #tpu.dot_dimension_numbers<[1], [0], [0], [1], [0, 0, 1, 1], [], []>, precision = #tpu.contract_precision<fp32>} : vector<4x1xf32>, vector<1x256xf32>, vector<4x256xf32> -> vector<4x256xf32>
    %48 = arith.mulf %3, %46 : vector<8x256xf32>
    %cst_37 = arith.constant dense<0.000000e+00> : vector<4x256xf32>
    %49 = tpu.matmul %8, %48, %cst_37 {dimension_numbers = #tpu.dot_dimension_numbers<[1], [0], [0], [1], [0, 0, 1, 1], [], []>, precision = #tpu.contract_precision<fp32>} : vector<4x8xf32>, vector<8x256xf32>, vector<4x256xf32> -> vector<4x256xf32>
    %50 = vector.broadcast %13 : vector<4x1xf32> to vector<4x256xf32>
    %51 = arith.addf %49, %50 : vector<4x256xf32>
    %cst_38 = arith.constant 0.000000e+00 : f32
    %52 = vector.broadcast %cst_38 : f32 to vector<4x256xf32>
    %53 = arith.maximumf %51, %52 : vector<4x256xf32>
    %c0_39 = arith.constant 0 : index
    %c0_40 = arith.constant 0 : index
    %54 = vector.load %arg4[%c0_39, %c0_40] : memref<36x256xf32, #tpu.memory_space<vmem>>, vector<36x256xf32>
    %c17_i32_41 = arith.constant 17 : i32
    %55 = tpu.dynamic_rotate %53 by %c17_i32_41 dim 1 : vector<4x256xf32>, i32 -> vector<4x256xf32>
    %c16_i32_42 = arith.constant 16 : i32
    %56 = tpu.dynamic_rotate %53 by %c16_i32_42 dim 1 : vector<4x256xf32>, i32 -> vector<4x256xf32>
    %c15_i32_43 = arith.constant 15 : i32
    %57 = tpu.dynamic_rotate %53 by %c15_i32_43 dim 1 : vector<4x256xf32>, i32 -> vector<4x256xf32>
    %c1_i32_44 = arith.constant 1 : i32
    %58 = tpu.dynamic_rotate %53 by %c1_i32_44 dim 1 : vector<4x256xf32>, i32 -> vector<4x256xf32>
    %c255_i32_45 = arith.constant 255 : i32
    %59 = tpu.dynamic_rotate %53 by %c255_i32_45 dim 1 : vector<4x256xf32>, i32 -> vector<4x256xf32>
    %c241_i32_46 = arith.constant 241 : i32
    %60 = tpu.dynamic_rotate %53 by %c241_i32_46 dim 1 : vector<4x256xf32>, i32 -> vector<4x256xf32>
    %c240_i32_47 = arith.constant 240 : i32
    %61 = tpu.dynamic_rotate %53 by %c240_i32_47 dim 1 : vector<4x256xf32>, i32 -> vector<4x256xf32>
    %c239_i32_48 = arith.constant 239 : i32
    %62 = tpu.dynamic_rotate %53 by %c239_i32_48 dim 1 : vector<4x256xf32>, i32 -> vector<4x256xf32>
    %63 = tpu.concatenate %55, %56, %57, %58, %53, %59, %60, %61, %62 in 0 : vector<4x256xf32>, vector<4x256xf32>, vector<4x256xf32>, vector<4x256xf32>, vector<4x256xf32>, vector<4x256xf32>, vector<4x256xf32>, vector<4x256xf32>, vector<4x256xf32> -> vector<36x256xf32>
    %64 = arith.mulf %63, %54 : vector<36x256xf32>
    %cst_49 = arith.constant dense<0.000000e+00> : vector<4x256xf32>
    %65 = tpu.matmul %5, %64, %cst_49 {dimension_numbers = #tpu.dot_dimension_numbers<[1], [0], [0], [1], [0, 0, 1, 1], [], []>, precision = #tpu.contract_precision<fp32>} : vector<4x36xf32>, vector<36x256xf32>, vector<4x256xf32> -> vector<4x256xf32>
    %66 = vector.broadcast %14 : vector<4x1xf32> to vector<4x256xf32>
    %67 = arith.addf %65, %66 : vector<4x256xf32>
    %cst_50 = arith.constant 0.000000e+00 : f32
    %68 = vector.broadcast %cst_50 : f32 to vector<4x256xf32>
    %69 = arith.maximumf %67, %68 : vector<4x256xf32>
    %cst_51 = arith.constant dense<0.000000e+00> : vector<4x256xf32>
    %70 = tpu.matmul %9, %3, %cst_51 {dimension_numbers = #tpu.dot_dimension_numbers<[1], [0], [0], [1], [0, 0, 1, 1], [], []>, precision = #tpu.contract_precision<fp32>} : vector<4x8xf32>, vector<8x256xf32>, vector<4x256xf32> -> vector<4x256xf32>
    %71 = vector.broadcast %15 : vector<4x1xf32> to vector<4x256xf32>
    %72 = arith.addf %70, %71 : vector<4x256xf32>
    %73 = arith.mulf %69, %47 : vector<4x256xf32>
    %74 = arith.addf %72, %73 : vector<4x256xf32>
    %c0_52 = arith.constant 0 : index
    %c0_53 = arith.constant 0 : index
    %c0_54 = arith.constant 0 : index
    %75 = vector.load %arg10[%c0_52, %c0_53, %c0_54] : memref<1x4x256xf32, #tpu.memory_space<vmem>>, vector<1x4x256xf32>
    %76 = vector.shape_cast %75 : vector<1x4x256xf32> to vector<4x256xf32>
    %77 = vector.shape_cast %74 : vector<4x256xf32> to vector<1x4x256xf32>
    tpu.vector_store %arg10[%c0_52, %c0_53, %c0_54], %77 {strides = array<i32>} : memref<1x4x256xf32, #tpu.memory_space<vmem>>, vector<1x4x256xf32>,
    return
  }
  func.func @transform_0(%arg0: i32) -> (i32, i32, i32) {
    %c0_i32 = arith.constant 0 : i32
    %c0_i32_0 = arith.constant 0 : i32
    %c0_i32_1 = arith.constant 0 : i32
    return %arg0, %c0_i32, %c0_i32_0 : i32, i32, i32
  }
  func.func @transform_1(%arg0: i32) -> (i32, i32, i32) {
    %c0_i32 = arith.constant 0 : i32
    %c0_i32_0 = arith.constant 0 : i32
    %c0_i32_1 = arith.constant 0 : i32
    return %arg0, %c0_i32, %c0_i32_0 : i32, i32, i32
  }
  func.func @transform_2(%arg0: i32) -> (i32, i32) {
    %c0_i32 = arith.constant 0 : i32
    %c0_i32_0 = arith.constant 0 : i32
    %c0_i32_1 = arith.constant 0 : i32
    return %c0_i32, %c0_i32_0 : i32, i32
  }
  func.func @transform_3(%arg0: i32) -> (i32, i32) {
    %c0_i32 = arith.constant 0 : i32
    %c0_i32_0 = arith.constant 0 : i32
    %c0_i32_1 = arith.constant 0 : i32
    return %c0_i32, %c0_i32_0 : i32, i32
  }
  func.func @transform_4(%arg0: i32) -> (i32, i32) {
    %c0_i32 = arith.constant 0 : i32
    %c0_i32_0 = arith.constant 0 : i32
    %c0_i32_1 = arith.constant 0 : i32
    return %c0_i32, %c0_i32_0 : i32, i32
  }
  func.func @transform_5(%arg0: i32) -> (i32, i32) {
    %c0_i32 = arith.constant 0 : i32
    %c0_i32_0 = arith.constant 0 : i32
    %c0_i32_1 = arith.constant 0 : i32
    return %c0_i32, %c0_i32_0 : i32, i32
  }
  func.func @transform_6(%arg0: i32) -> (i32, i32) {
    %c0_i32 = arith.constant 0 : i32
    %c0_i32_0 = arith.constant 0 : i32
    %c0_i32_1 = arith.constant 0 : i32
    return %c0_i32, %c0_i32_0 : i32, i32
  }
  func.func @transform_7(%arg0: i32) -> (i32, i32) {
    %c0_i32 = arith.constant 0 : i32
    %c0_i32_0 = arith.constant 0 : i32
    %c0_i32_1 = arith.constant 0 : i32
    return %c0_i32, %c0_i32_0 : i32, i32
  }
  func.func @transform_8(%arg0: i32) -> (i32, i32) {
    %c0_i32 = arith.constant 0 : i32
    %c0_i32_0 = arith.constant 0 : i32
    %c0_i32_1 = arith.constant 0 : i32
    return %c0_i32, %c0_i32_0 : i32, i32
  }
  func.func @transform_9(%arg0: i32) -> (i32, i32, i32) {
    %c0_i32 = arith.constant 0 : i32
    %c0_i32_0 = arith.constant 0 : i32
    %c0_i32_1 = arith.constant 0 : i32
    return %arg0, %c0_i32, %c0_i32_0 : i32, i32, i32
  }
}

</mosaic_0001>

<bundles_post_ra>
// kernel: tpu_custom_call.1
= control target key start
LH: loop header
LB: loop body
LE: loop exit
PB: predicated region body
PF: predicated region fallthrough
CT: control target
= control target key end

     0   :  { %14 = vsyncpa [#allocation3], 0  ;;  %s7452_s0 = inlined_call_operand.vmem [shape: f32[2,4,256], index: 0, kind: input, shape index: {}]   ;;  %s7453_s1 = inlined_call_operand.vmem [shape: f32[2,8,256], index: 1, kind: input, shape index: {}]   ;;  %s7454_s2 = inlined_call_operand.vmem [shape: f32[36,256], index: 2, kind: input, shape index: {}]   ;;  %s7455_s3 = inlined_call_operand.vmem [shape: f32[36,256], index: 3, kind: input, shape index: {}]   ;;  %s7456_s4 = inlined_call_operand.vmem [shape: f32[256,1], index: 4, kind: input, shape index: {}]   ;;  %s7457_s5 = inlined_call_operand.vmem [shape: f32[1,256], index: 5, kind: input, shape index: {}]   ;;  %s7458_s6 = inlined_call_operand.vmem [shape: f32[8,36], index: 6, kind: input, shape index: {}]   ;;  %s7459_s7 = inlined_call_operand.vmem [shape: f32[20,8], index: 7, kind: input, shape index: {}]   ;;  %s7460_s8 = inlined_call_operand.vmem [shape: f32[8,6], index: 8, kind: input, shape index: {}]   ;;  %s7461_s9 = inlined_call_operand.hbm [shape: f32[2,4,256], index: 9, kind: output, shape index: {}]  }
   0x1   :  { %16 = vsyncpa [#allocation3 + $0x1], 0  ;;  %s6057_s30 = smov 0   ;;  %s6059_s10 = smov 0  }
   0x2   :  { %s6061_s11 = smov 0   ;;  %s6063_s12 = smov 0  }
   0x3 LB: > { %s6078_s13 = sadd.s32 4294967295, %s5989_s12   ;;  %s5553_s14 = sadd.s32 4294967294, %s5989_s12   ;;  %s5989_s12 = sphi %s6063_s12, %s7646_s12   ;;  %s5985_s11 = sphi %s6061_s11, %s7645_s11   ;;  %s5981_s10 = sphi %s6059_s10, %s7644_s10   ;;  %s5977_s30 = sphi %s6057_s30, %s7643_s30  }
   0x4   : > { %s6082_s15 = sadd.s32 1, %s5989_s12   ;;  %s228_s16 = sadd.s32 1, %s5985_s11 }
   0x5   : > { %s225_s17 = ssub.s32 %s5989_s12, %s6082_s15  ;;  %p238_p0 = scmp.ne.s32.totalorder %s5985_s11, %s5981_s10 }
   0x6   : > { %p226_p1 = scmp.eq.s32.totalorder %s225_s17, 0  ;;  %p239_p2 = scmp.eq.s32.totalorder %s6078_s13, 1 }
   0x7   : > { %p244_p3 = scmp.ne.s32.totalorder %s5981_s10, %s5977_s30  ;;  %p245_p4 = scmp.eq.s32.totalorder %s5553_s14, 1 }
   0x8   : > { %s6093_s18 = scalar_select %p226_p1, %s5985_s11, %s228_s16  }
   0x9   : > { %p6095_p5 = por %p239_p2, %p238_p0  ;;  %p6099_p6 = por %p245_p4, %p244_p3 }
   0xa   : > { %p5556_p7 = scmp.ge.s32.totalorder %s5989_s12, 1  ;;  %p300_p8 = scmp.lt.s32.totalorder %s5989_s12, 3 }
   0xc   : > { %p301_p9 = pnand %p5556_p7, %p300_p8 }
   0xe   : > { %304 = sbr.rel (%p301_p9) target bundleno = 1998 (0x7ce), region = 56 }
  0x13   : > { %p341_p10 = scmp.lt.s32.totalorder %s6078_s13, 1  ;;  %s5991_s26 = smov 111   ;;  %v7471_v2 = vmov 0.0   ;;  %v360_v3 = vld [vmem:[%s7460_s8] sm:$0xf]  ;;  %v6000_v4 = vmov 0   ;;  %v7470_v5 = vlaneseq }
  0x14   : > { %s5992_s27 = smov 112   ;;  %s5993_s28 = smov 127   ;;  %565 = vmatprep.mubr.f32.mxu0 %v7471_v2  ;;  %691 = vmatprep.mubr.f32.mxu1 %v7471_v2  ;;  %v370_v9 = vld [vmem:[%s7454_s2 + $0x40] sm:$0xf]  ;;  %v371_v10 = vld [vmem:[%s7454_s2 + $0x48] sm:$0xf] }
  0x15   : > { %s6107_s21 = scalar_select %p341_p10, %s6078_s13, 1  ;;  %5918 = vset.pattern.permute.xlu0 %v6000_v4  ;;  %v6158_v6 = vand.u32 127, %v7470_v5  ;;  %vm457_vm1 = vcmask 1043456   ;;  %v354_v15 = vld [vmem:[%s7458_s6] sm:$0xf]  ;;  %vm481_vm2 = vcmask 293888  }
  0x16   : > { %s5994_s29 = smov 113   ;;  %s7468_s14 = smov 1   ;;  %v483_v22 = vsel %vm481_vm2, %v354_v15, 0  ;;  %v366_v27 = vld [vmem:[%s7454_s2 + $0x20] sm:$0xff]  ;;  %v367_v28 = vld [vmem:[%s7454_s2 + $0x28] sm:$0xff]  ;;  %v368_v41 = vld [vmem:[%s7454_s2 + $0x30] sm:$0xff] }
  0x17   : > { %s5567_s22 = sshll.u32 %s6107_s21, 3  ;;  %s7466_s16 = smov 16   ;;  %7553 = vst [vmem:[#allocation5_spill] sm:$0xff] %v6158_v6  ;;  %vm430_vm0 = vcmp.lt.s32.totalorder %v6158_v6, 111  ;;  %vm409_vm3 = vcmp.lt.s32.totalorder %v6158_v6, 127  ;;  %vm423_vm4 = vcmp.lt.s32.totalorder %v6158_v6, 112 }
  0x18   : > { %s345_s25 = scalar_lea.vmem %s7452_s0, %s5567_s22  ;;  %s7462_s17 = smov 15   ;;  %vm416_vm5 = vcmp.lt.s32.totalorder %v6158_v6, 113  ;;  %v6205_v35 = vand.u32 4294901760, %v483_v22  ;;  %v369_v42 = vld [vmem:[%s7454_s2 + $0x38] sm:$0xff]  ;;  %vm402_vm6 = vcmp.lt.s32.totalorder %v6158_v6, 1  ;;  %vm388_vm7 = vcmp.lt.s32.totalorder %v6158_v6, 16 }
  0x19   : > { %v6113_v0 = vld [vmem:[%s345_s25] sm:$0xff]  ;;  %s7464_s22 = smov 17   ;;  %vm395_vm8 = vcmp.lt.s32.totalorder %v6158_v6, 15  ;;  %vm381_vm9 = vcmp.lt.s32.totalorder %v6158_v6, 17  ;;  %vm6001_vm10 = vmmov 0   ;;  %vm1959_vm11 = vcmask 31744  }
  0x1a   : > { %426 = vrot.lane.b32.xlu1 %v6113_v0, %s5991_s26  ;;  %419 = vrot.lane.b32.xlu0 %v6113_v0, %s5992_s27  ;;  %v6121_v1 = vcombine.high %v6113_v0, %v6113_v0  ;;  %vm2888_vm12 = vcmask 1040384   ;;  %vm2884_vm13 = vcmask 7168   ;;  %vm3831_vm14 = vcmask 64512   ;;  %s5568_s23 = sshll.u32 %s6107_s21, 4  ;;  %s7638_s21 = smov 1  }
  0x1b   : > { %s7641_s25 = smov 17  }
  0x1e   : > { %405 = vrot.lane.b32.xlu0 %v6113_v0, %s5993_s28  ;;  %428 = vrot.lane.b32.xlu1 %v6121_v1, %s5991_s26 }
  0x22   : > { %407 = vrot.lane.b32.xlu1 %v6121_v1, %s5993_s28  ;;  %421 = vrot.lane.b32.xlu0 %v6121_v1, %s5992_s27 }
  0x26   : > { %414 = vrot.lane.b32.xlu1 %v6121_v1, %s5994_s29  ;;  %412 = vrot.lane.b32.xlu0 %v6113_v0, %s5994_s29 }
  0x2a   : > { %400 = vrot.lane.b32.xlu1 %v6121_v1, %s7468_s14  ;;  %398 = vrot.lane.b32.xlu0 %v6113_v0, %s7468_s14  ;;  %s350_s14 = scalar_lea.vmem %s7453_s1, %s5568_s23 }
  0x2e   : > { %386 = vrot.lane.b32.xlu1 %v6121_v1, %s7466_s16  ;;  %384 = vrot.lane.b32.xlu0 %v6113_v0, %s7466_s16 }
  0x32   : > { %393 = vrot.lane.b32.xlu1 %v6121_v1, %s7462_s17  ;;  %391 = vrot.lane.b32.xlu0 %v6113_v0, %s7462_s17  ;;  %s7639_s17 = smov 16  }
  0x36   : > { %377 = vrot.lane.b32.xlu1 %v6121_v1, %s7464_s22  ;;  %375 = vrot.lane.b32.xlu0 %v6113_v0, %s7464_s22  ;;  %s6002_s22 = smov 126  }
  0x3a   : > { %1956 = vrot.lane.b32.xlu1 %v360_v3, %s5993_s28  ;;  %478 = vperm.xlu0 %5918, %v360_v3  }
  0x8c   : > { %v427_v7 = vpop.permute.xlu1 %426  ;;  %v420_v8 = vpop.permute.xlu0 %419 }
  0x90   : > { %v406_v11 = vpop.permute.xlu0 %405  ;;  %v429_v12 = vpop.permute.xlu1 %428 }
  0x91   : > { %v431_v13 = vsel %vm430_vm0, %v427_v7, %v429_v12  ;;  %v432_v14 = vsel %vm430_vm0, %v429_v12, %v427_v7 }
  0x92   : > { %v474_v16 = vmul.f32 %v431_v13, %v370_v9  ;;  %v475_v17 = vmul.f32 %v432_v14, %v371_v10 }
  0x94   : > { %v486_v18 = vsel %vm457_vm1, %v474_v16, 0  ;;  %v489_v19 = vsel %vm457_vm1, %v475_v17, 0  ;;  %v408_v20 = vpop.permute.xlu1 %407  ;;  %v422_v21 = vpop.permute.xlu0 %421 }
  0x95   : > { %v6180_v23 = vand.u32 4294901760, %v489_v19  ;;  %v6182_v24 = vand.u32 4294901760, %v486_v18  ;;  %v410_v25 = vsel %vm409_vm3, %v406_v11, %v408_v20  ;;  %v411_v26 = vsel %vm409_vm3, %v408_v20, %v406_v11 }
  0x96   : > { %v447_v29 = vrot.slane %v410_v25, 4  ;;  %v448_v30 = vrot.slane %v411_v26, 4  ;;  %v424_v31 = vsel %vm423_vm4, %v420_v8, %v422_v21  ;;  %v425_v32 = vsel %vm423_vm4, %v422_v21, %v420_v8  ;;  %v364_v26 = vld [vmem:[%s7454_s2 + $0x10] sm:$0xff] }
  0x97   : > { %v6199_v33 = vsub.f32 %v486_v18, %v6182_v24  ;;  %514 = vmatprep.subr.mxu0 %v6180_v23  ;;  %v6203_v34 = vsub.f32 %v489_v19, %v6180_v23  ;;  %v453_v38 = vrot.slane %v424_v31, 4  ;;  %v454_v39 = vrot.slane %v425_v32, 4 }
  0x98   : > { %v462_v36 = vsel %vm457_vm1, %v6113_v0, %v447_v29  ;;  %v463_v37 = vsel %vm457_vm1, %v6121_v1, %v448_v30  ;;  %516 = vmatpush1.msra.mxu0 %v6182_v24  ;;  %v415_v40 = vpop.permute.xlu1 %414  ;;  %v413_v43 = vpop.permute.xlu0 %412  ;;  %v6242_v0 = vsub.f32 %v483_v22, %v6205_v35 }
  0x99   : > { %v470_v44 = vmul.f32 %v462_v36, %v366_v27  ;;  %v471_v45 = vmul.f32 %v463_v37, %v367_v28  ;;  %v417_v46 = vsel %vm416_vm5, %v413_v43, %v415_v40  ;;  %v418_v47 = vsel %vm416_vm5, %v415_v40, %v413_v43  ;;  %v365_v27 = vld [vmem:[%s7454_s2 + $0x18] sm:$0xff] }
  0x9a   : > { %v464_v48 = vsel %vm457_vm1, %v417_v46, %v453_v38  ;;  %v465_v49 = vsel %vm457_vm1, %v418_v47, %v454_v39  ;;  %v601_v50 = vand.u32 4294901760, %v6203_v34  ;;  %v607_v51 = vand.u32 4294901760, %v6199_v33  ;;  %v362_v46 = vld [vmem:[%s7454_s2] sm:$0xff]  ;;  %v363_v47 = vld [vmem:[%s7454_s2 + $0x8] sm:$0xff] }
  0x9b   : > { %v472_v52 = vmul.f32 %v464_v48, %v368_v41  ;;  %v473_v53 = vmul.f32 %v465_v49, %v369_v42  ;;  %v6226_v54 = vand.u32 4294901760, %v471_v45  ;;  %v6228_v55 = vand.u32 4294901760, %v470_v44 }
  0x9c   : > { %v401_v56 = vpop.permute.xlu1 %400  ;;  %v399_v57 = vpop.permute.xlu0 %398  ;;  %v602_v58 = vsub.f32 %v6203_v34, %v601_v50  ;;  %v608_v59 = vsub.f32 %v6199_v33, %v607_v51  ;;  %v568_v16 = vand.u32 4294901760, %v6242_v0 }
  0x9d   : > { %v6236_v60 = vand.u32 4294901760, %v473_v53  ;;  %v6238_v61 = vand.u32 4294901760, %v472_v52  ;;  %v6252_v4 = vsub.f32 %v471_v45, %v6226_v54  ;;  %v6255_v7 = vsub.f32 %v470_v44, %v6228_v55 }
  0x9e   : > { %v603_v62 = vand.u32 4294901760, %v602_v58  ;;  %v609_v63 = vand.u32 4294901760, %v608_v59  ;;  %v403_v8 = vsel %vm402_vm6, %v399_v57, %v401_v56  ;;  %v404_v9 = vsel %vm402_vm6, %v401_v56, %v399_v57 }
  0x9f   : > { %v6245_v1 = vsub.f32 %v473_v53, %v6236_v60  ;;  %v6248_v3 = vsub.f32 %v472_v52, %v6238_v61  ;;  %518 = vmatprep.subr.mxu0 %v6236_v60  ;;  %v625_v14 = vand.u32 4294901760, %v6252_v4  ;;  %v631_v15 = vand.u32 4294901760, %v6255_v7 }
  0xa0   : > { %604 = vmatprep.subr.mxu1 %v603_v62  ;;  %v387_v10 = vpop.permute.xlu1 %386  ;;  %520 = vmatpush1.msra.mxu0 %v6238_v61  ;;  %v385_v11 = vpop.permute.xlu0 %384  ;;  %v441_v17 = vrot.slane %v404_v9, 4  ;;  %v442_v18 = vrot.slane %v403_v8, 4  ;;  %v569_v52 = vsub.f32 %v6242_v0, %v568_v16 }
  0xa1   : > { %610 = vmatpush1.msra.mxu1 %v609_v63  ;;  %522 = vmatprep.subr.mxu0 %v6226_v54  ;;  %v613_v12 = vand.u32 4294901760, %v6245_v1  ;;  %v619_v13 = vand.u32 4294901760, %v6248_v3  ;;  %v389_v21 = vsel %vm388_vm7, %v385_v11, %v387_v10  ;;  %v390_v22 = vsel %vm388_vm7, %v387_v10, %v385_v11 }
  0xa2   : > { %524 = vmatpush1.msra.mxu0 %v6228_v55  ;;  %v626_v29 = vsub.f32 %v6252_v4, %v625_v14  ;;  %v632_v30 = vsub.f32 %v6255_v7, %v631_v15  ;;  %v435_v43 = vrot.slane %v390_v22, 4  ;;  %v436_v44 = vrot.slane %v389_v21, 4 }
  0xa3   : > { %v614_v19 = vsub.f32 %v6245_v1, %v613_v12  ;;  %v620_v20 = vsub.f32 %v6248_v3, %v619_v13  ;;  %v570_v11 = vand.u32 4294901760, %v569_v52  ;;  %v1073_v52 = vld [vmem:[%s7456_s4 + $0x58] sm:$0xff] }
  0xa4   : > { %v394_v25 = vpop.permute.xlu1 %393  ;;  %v392_v28 = vpop.permute.xlu0 %391  ;;  %v627_v42 = vand.u32 4294901760, %v626_v29  ;;  %v633_v49 = vand.u32 4294901760, %v632_v30 }
  0xa5   : > { %v396_v31 = vsel %vm395_vm8, %v392_v28, %v394_v25  ;;  %v397_v32 = vsel %vm395_vm8, %v394_v25, %v392_v28  ;;  %v615_v36 = vand.u32 4294901760, %v614_v19  ;;  %v621_v37 = vand.u32 4294901760, %v620_v20 }
  0xa6   : > { %v460_v38 = vsel %vm457_vm1, %v397_v32, %v441_v17  ;;  %v461_v39 = vsel %vm457_vm1, %v396_v31, %v442_v18 }
  0xa7   : > { %v468_v40 = vmul.f32 %v460_v38, %v364_v26  ;;  %v469_v41 = vmul.f32 %v461_v39, %v365_v27  ;;  %616 = vmatprep.subr.mxu1 %v615_v36 }
  0xa8   : > { %v378_v45 = vpop.permute.xlu1 %377  ;;  %622 = vmatpush1.msra.mxu1 %v621_v37  ;;  %v376_v48 = vpop.permute.xlu0 %375 }
  0xa9   : > { %v6309_v53 = vand.u32 4294901760, %v469_v41  ;;  %v6311_v56 = vand.u32 4294901760, %v468_v40  ;;  %v382_v57 = vsel %vm381_vm9, %v376_v48, %v378_v45  ;;  %v383_v58 = vsel %vm381_vm9, %v378_v45, %v376_v48  ;;  %628 = vmatprep.subr.mxu1 %v627_v42  ;;  %v1089_v45 = vld [vmem:[%s7456_s4 + $0xd8] sm:$0xff] }
  0xaa   : > { %v458_v59 = vsel %vm457_vm1, %v383_v58, %v435_v43  ;;  %v459_v62 = vsel %vm457_vm1, %v382_v57, %v436_v44  ;;  %634 = vmatpush1.msra.mxu1 %v633_v49 }
  0xab   : > { %v636_v63 = vsub.f32 %v469_v41, %v6309_v53  ;;  %v642_v8 = vsub.f32 %v468_v40, %v6311_v56  ;;  %v466_v9 = vmul.f32 %v458_v59, %v362_v46  ;;  %v467_v10 = vmul.f32 %v459_v62, %v363_v47  ;;  %526 = vmatprep.subr.mxu0 %v6309_v53  ;;  %v1074_v40 = vld [vmem:[%s7456_s4 + $0x60] sm:$0xff]  ;;  %v1088_v59 = vld [vmem:[%s7456_s4 + $0xd0] sm:$0xff] }
  0xac   : > { %528 = vmatpush1.msra.mxu0 %v6311_v56  ;;  %v6450_v44 = vand.u32 4294901760, %v1074_v40 }
  0xad   : > { %v6323_v17 = vand.u32 4294901760, %v467_v10  ;;  %v6325_v18 = vand.u32 4294901760, %v466_v9  ;;  %v637_v19 = vand.u32 4294901760, %v636_v63  ;;  %v643_v20 = vand.u32 4294901760, %v642_v8 }
  0xae   : > { %v6472_v58 = vsub.f32 %v1074_v40, %v6450_v44 }
  0xaf   : > { %v648_v21 = vsub.f32 %v467_v10, %v6323_v17  ;;  %v654_v22 = vsub.f32 %v466_v9, %v6325_v18  ;;  %530 = vmatprep.subr.mxu0 %v6323_v17  ;;  %v638_v25 = vsub.f32 %v636_v63, %v637_v19  ;;  %v644_v26 = vsub.f32 %v642_v8, %v643_v20  ;;  %v1072_v10 = vld [vmem:[%s7456_s4 + $0x50] sm:$0xff] }
  0xb0   : > { %532 = vmatpush1.msra.mxu0 %v6325_v18  ;;  %v6482_v9 = vand.u32 4294901760, %v1089_v45 }
  0xb1   : > { %723 = vmatprep.subr.mxu0 %v6203_v34  ;;  %571 = vmatmul.mubr.f32.vlgmr.msra.gmra.mxu0 %v570_v11  ;;  %v639_v27 = vand.u32 4294901760, %v638_v25  ;;  %v645_v28 = vand.u32 4294901760, %v644_v26  ;;  %v649_v29 = vand.u32 4294901760, %v648_v21  ;;  %v655_v30 = vand.u32 4294901760, %v654_v22 }
  0xb2   : > { %726 = vmatpush1.msra.mxu0 %v6199_v33  ;;  %783 = vmatprep.mubr.f32.mxu0 %v7471_v2  ;;  %v1077_v33 = vld [vmem:[%s7456_s4 + $0x78] sm:$0xff]  ;;  %v6500_v25 = vsub.f32 %v1089_v45, %v6482_v9  ;;  %v6502_v26 = vand.u32 4294901760, %v1088_v59 }
  0xb3   : > { %640 = vmatprep.subr.mxu1 %v639_v27  ;;  %729 = vmatprep.subr.mxu0 %v6245_v1  ;;  %v650_v31 = vsub.f32 %v648_v21, %v649_v29  ;;  %v656_v32 = vsub.f32 %v654_v22, %v655_v30  ;;  %v6387_v34 = vand.u32 4294901760, %v1077_v33  ;;  %v1071_v27 = vld [vmem:[%s7456_s4 + $0x48] sm:$0xff] }
  0xb4   : > { %646 = vmatpush1.msra.mxu1 %v645_v28  ;;  %732 = vmatpush1.msra.mxu0 %v6248_v3 }
  0xb5   : > { %735 = vmatprep.subr.mxu0 %v6252_v4  ;;  %v651_v36 = vand.u32 4294901760, %v650_v31  ;;  %v657_v37 = vand.u32 4294901760, %v656_v32  ;;  %v1075_v4 = vld [vmem:[%s7456_s4 + $0x68] sm:$0xff]  ;;  %v6514_v31 = vand.u32 4294901760, %v1072_v10  ;;  %v1086_v32 = vld [vmem:[%s7456_s4 + $0xc0] sm:$0xff] }
  0xb6   : > { %738 = vmatpush1.msra.mxu0 %v6255_v7  ;;  %v6544_v45 = vand.u32 4294901760, %v1086_v32 }
  0xb7   : > { %652 = vmatprep.subr.mxu1 %v651_v36  ;;  %741 = vmatprep.subr.mxu0 %v636_v63 }
  0xb8   : > { %658 = vmatpush1.msra.mxu1 %v657_v37  ;;  %744 = vmatpush1.msra.mxu0 %v642_v8  ;;  %v7480_v37 = vand.u32 4294901760, %v6500_v25 }
  0xb9   : > { %693 = vmatmul.mubr.f32.vlgmr.msra.gmra.mxu1 %v6205_v35  ;;  %747 = vmatprep.subr.mxu0 %v648_v21 }
  0xba   : > { %815 = vmatprep.subr.mxu1 %v6180_v23  ;;  %750 = vmatpush1.msra.mxu0 %v654_v22 }
  0xbb   : > { %817 = vmatpush1.msra.mxu1 %v6182_v24  ;;  %786 = vmatmul.mubr.f32.vlgmr.msra.gmra.mxu0 %v6242_v0 }
  0xbc   : > { %819 = vmatprep.subr.mxu1 %v6236_v60  ;;  %901 = vmatprep.subr.mxu0 %v601_v50  ;;  %v1092_v50 = vld [vmem:[%s7456_s4 + $0xf0] sm:$0xff] }
  0xbd   : > { %821 = vmatpush1.msra.mxu1 %v6238_v61  ;;  %905 = vmatpush1.msra.mxu0 %v607_v51 }
  0xbe   : > { %823 = vmatprep.subr.mxu1 %v6226_v54  ;;  %909 = vmatprep.subr.mxu0 %v613_v12 }
  0xbf   : > { %825 = vmatpush1.msra.mxu1 %v6228_v55  ;;  %913 = vmatpush1.msra.mxu0 %v619_v13  ;;  %v6424_v13 = vand.u32 4294901760, %v1075_v4 }
  0xc0   : > { %827 = vmatprep.subr.mxu1 %v6309_v53  ;;  %917 = vmatprep.subr.mxu0 %v625_v14  ;;  %v1090_v14 = vld [vmem:[%s7456_s4 + $0xe0] sm:$0xff] }
  0xc1   : > { %829 = vmatpush1.msra.mxu1 %v6311_v56  ;;  %921 = vmatpush1.msra.mxu0 %v631_v15  ;;  %v6437_v39 = vand.u32 4294901760, %v1090_v14  ;;  %v6448_v43 = vsub.f32 %v1075_v4, %v6424_v13  ;;  %v6532_v4 = vsub.f32 %v1072_v10, %v6514_v31  ;;  %v6565_v10 = vsub.f32 %v1086_v32, %v6544_v45 }
  0xc2   : > { %831 = vmatprep.subr.mxu1 %v6323_v17  ;;  %925 = vmatprep.subr.mxu0 %v637_v19  ;;  %v6491_v19 = vand.u32 4294901760, %v1073_v52 }
  0xc3   : > { %833 = vmatpush1.msra.mxu1 %v6325_v18  ;;  %866 = vmatprep.mubr.f32.mxu1 %v7471_v2  ;;  %v6461_v49 = vsub.f32 %v1090_v14, %v6437_v39  ;;  %v7485_v57 = vand.u32 4294901760, %v6448_v43  ;;  %v6534_v14 = vand.u32 4294901760, %v1071_v27  ;;  %v7475_v32 = vand.u32 4294901760, %v6565_v10 }
  0xc4   : > { %929 = vmatpush1.msra.mxu0 %v643_v20  ;;  %870 = vmatmul.mubr.f32.vlgmr.msra.gmra.mxu1 %v568_v16  ;;  %v1087_v20 = vld [vmem:[%s7456_s4 + $0xc8] sm:$0xff] }
  0xc5   : > { %933 = vmatprep.subr.mxu0 %v649_v29  ;;  %1001 = vmatprep.subr.mxu1 %v6180_v23  ;;  %v1093_v23 = vld [vmem:[%s7456_s4 + $0xf8] sm:$0xff]  ;;  %v7483_v8 = vand.u32 4294901760, %v6461_v49 }
  0xc6   : > { %937 = vmatpush1.msra.mxu0 %v655_v30  ;;  %970 = vmatprep.mubr.f32.mxu0 %v7471_v2  ;;  %v6512_v30 = vsub.f32 %v1073_v52, %v6491_v19  ;;  %v6552_v52 = vsub.f32 %v1071_v27, %v6534_v14  ;;  %v1084_v27 = vld [vmem:[%s7456_s4 + $0xb0] sm:$0xff] }
  0xc7   : > { %1003 = vmatpush1.msra.mxu1 %v6182_v24  ;;  %972 = vmatmul.mubr.f32.vlgmr.msra.gmra.mxu0 %v6205_v35  ;;  %v6382_v24 = vand.u32 4294901760, %v1093_v23  ;;  %v1343_v22 = vsub.f32 %v6461_v49, %v7483_v8 }
  0xc8   : > { %1005 = vmatprep.subr.mxu1 %v6236_v60  ;;  %1052 = vmatprep.mubr.f32.mxu1 %v7471_v2  ;;  %v1371_v2 = vsub.f32 %v6565_v10, %v7475_v32 }
  0xc9   : > { %1007 = vmatpush1.msra.mxu1 %v6238_v61  ;;  %7554 = vst [vmem:[#allocation6_spill] sm:$0xff] %v6382_v24  ;;  %v6393_v51 = vsub.f32 %v1093_v23, %v6382_v24  ;;  %5570 = vmatprep.subr.mxu0 %v6382_v24  ;;  %v1091_v61 = vld [vmem:[%s7456_s4 + $0xe8] sm:$0xff]  ;;  %v1344_v36 = vand.u32 4294901760, %v1343_v22  ;;  %v6522_v23 = vsub.f32 %v1088_v59, %v6502_v26 }
  0xca   : > { %1009 = vmatprep.subr.mxu1 %v6226_v54  ;;  %v1076_v54 = vld [vmem:[%s7456_s4 + $0x70] sm:$0xff]  ;;  %5571 = vmatpush3.msra.mxu0 %v6387_v34  ;;  %v6414_v3 = vand.u32 4294901760, %v1091_v61 }
  0xcb   : > { %1011 = vmatpush1.msra.mxu1 %v6228_v55  ;;  %7555 = vst [vmem:[#allocation7_spill] sm:$0xff] %v6393_v51  ;;  %v6402_v55 = vsub.f32 %v1077_v33, %v6387_v34  ;;  %v6404_v60 = vand.u32 4294901760, %v1076_v54  ;;  %v7492_v0 = vand.u32 4294901760, %v6393_v51  ;;  %v6524_v33 = vand.u32 4294901760, %v1087_v20 }
  0xcc   : > { %1013 = vmatprep.subr.mxu1 %v6309_v53  ;;  %v6435_v38 = vsub.f32 %v1091_v61, %v6414_v3  ;;  %v7479_v61 = vand.u32 4294901760, %v6512_v30  ;;  %v7477_v40 = vand.u32 4294901760, %v6522_v23 }
  0xcd   : > { %1015 = vmatpush1.msra.mxu1 %v6311_v56  ;;  %v7490_v7 = vand.u32 4294901760, %v6402_v55  ;;  %v6422_v12 = vsub.f32 %v1076_v54, %v6404_v60  ;;  %v1322_v15 = vsub.f32 %v6393_v51, %v7492_v0 }
  0xce   : > { %1017 = vmatprep.subr.mxu1 %v6323_v17  ;;  %v7486_v48 = vand.u32 4294901760, %v6435_v38  ;;  %v1224_v17 = vsub.f32 %v6448_v43, %v7485_v57 }
  0xcf   : > { %1019 = vmatpush1.msra.mxu1 %v6325_v18  ;;  %v1210_v41 = vsub.f32 %v6402_v55, %v7490_v7  ;;  %v7487_v42 = vand.u32 4294901760, %v6422_v12  ;;  %v1323_v46 = vand.u32 4294901760, %v1322_v15  ;;  %v7481_v18 = vand.u32 4294901760, %v6472_v58 }
  0xd0   : > { %1054 = vmatmul.mubr.f32.vlgmr.msra.gmra.mxu1 %v6205_v35  ;;  %v6395_v35 = vand.u32 4294901760, %v1092_v50  ;;  %v1336_v63 = vsub.f32 %v6435_v38, %v7486_v48  ;;  %v1225_v28 = vand.u32 4294901760, %v1224_v17  ;;  %v1350_v15 = vsub.f32 %v6500_v25, %v7480_v37 }
  0xd1   : > { %v1211_v53 = vand.u32 4294901760, %v1210_v41  ;;  %v1217_v56 = vsub.f32 %v6422_v12, %v7487_v42  ;;  %5605 = vmatprep.subr.mxu1 %v1323_v46  ;;  %v1231_v29 = vsub.f32 %v6472_v58, %v7481_v18  ;;  %v6542_v41 = vsub.f32 %v1087_v20, %v6524_v33 }
  0xd2   : > { %v6412_v1 = vsub.f32 %v1092_v50, %v6395_v35  ;;  %5572 = vmatprep.subr.mxu0 %v6395_v35  ;;  %v1337_v21 = vand.u32 4294901760, %v1336_v63  ;;  %v1070_v50 = vld [vmem:[%s7456_s4 + $0x40] sm:$0xff]  ;;  %v1238_v46 = vsub.f32 %v6512_v30, %v7479_v61  ;;  %v1351_v59 = vand.u32 4294901760, %v1350_v15 }
  0xd3   : > { %5573 = vmatpush3.msra.mxu0 %v6404_v60  ;;  %5606 = vmatpush3.msra.mxu1 %v1211_v53  ;;  %v1218_v11 = vand.u32 4294901760, %v1217_v56  ;;  %v1232_v54 = vand.u32 4294901760, %v1231_v29  ;;  %v6554_v53 = vand.u32 4294901760, %v1070_v50  ;;  %v1085_v56 = vld [vmem:[%s7456_s4 + $0xb8] sm:$0xff]  ;;  %v7474_v63 = vand.u32 4294901760, %v6542_v41 }
  0xd4   : > { %v7489_v16 = vand.u32 4294901760, %v6412_v1  ;;  %5574 = vmatprep.subr.mxu0 %v6414_v3  ;;  %v1239_v17 = vand.u32 4294901760, %v1238_v46 }
  0xd5   : > { %5575 = vmatpush3.msra.mxu0 %v6424_v13  ;;  %v6576_v22 = vsub.f32 %v1070_v50, %v6554_v53  ;;  %v1364_v29 = vsub.f32 %v6542_v41, %v7474_v63  ;;  %v1068_v50 = vld [vmem:[%s7456_s4 + $0x30] sm:$0xff] }
  0xd6   : > { %v1329_v47 = vsub.f32 %v6412_v1, %v7489_v16  ;;  %5576 = vmatprep.subr.mxu0 %v6437_v39  ;;  %v6618_v32 = vand.u32 4294901760, %v1068_v50 }
  0xd7   : > { %5577 = vmatpush3.msra.mxu0 %v6450_v44  ;;  %v7478_v46 = vand.u32 4294901760, %v6576_v22  ;;  %v1365_v5 = vand.u32 4294901760, %v1364_v29 }
  0xd8   : > { %v1330_v62 = vand.u32 4294901760, %v1329_v47  ;;  %5578 = vmatprep.subr.mxu0 %v6482_v9  ;;  %v7476_v47 = vand.u32 4294901760, %v6532_v4 }
  0xd9   : > { %5579 = vmatpush3.msra.mxu0 %v6491_v19 }
  0xda   : > { %5607 = vmatprep.subr.mxu1 %v1330_v62  ;;  %5580 = vmatprep.subr.mxu0 %v6502_v26  ;;  %v1357_v62 = vsub.f32 %v6522_v23, %v7477_v40  ;;  %v1245_v20 = vsub.f32 %v6532_v4, %v7476_v47  ;;  %v1372_v47 = vand.u32 4294901760, %v1371_v2 }
  0xdb   : > { %5608 = vmatpush3.msra.mxu1 %v1218_v11  ;;  %5581 = vmatpush3.msra.mxu0 %v6514_v31  ;;  %v1069_v11 = vld [vmem:[%s7456_s4 + $0x38] sm:$0xff] }
  0xdc   : > { %5609 = vmatprep.subr.mxu1 %v1337_v21  ;;  %5582 = vmatprep.subr.mxu0 %v6524_v33  ;;  %v7473_v21 = vand.u32 4294901760, %v6552_v52 }
  0xdd   : > { %5610 = vmatpush3.msra.mxu1 %v1225_v28  ;;  %5583 = vmatpush3.msra.mxu0 %v6534_v14  ;;  %v1358_v28 = vand.u32 4294901760, %v1357_v62  ;;  %v1083_v62 = vld [vmem:[%s7456_s4 + $0xa8] sm:$0xff] }
  0xde   : > { %5611 = vmatprep.subr.mxu1 %v1344_v36  ;;  %5584 = vmatprep.subr.mxu0 %v6544_v45  ;;  %v6586_v36 = vand.u32 4294901760, %v1085_v56  ;;  %v1252_v15 = vsub.f32 %v6552_v52, %v7473_v21  ;;  %v1067_v21 = vld [vmem:[%s7456_s4 + $0x28] sm:$0xff]  ;;  %v6628_v40 = vand.u32 4294901760, %v1083_v62 }
  0xdf   : > { %5612 = vmatpush3.msra.mxu1 %v1232_v54  ;;  %5585 = vmatpush3.msra.mxu0 %v6554_v53  ;;  %v1246_v54 = vand.u32 4294901760, %v1245_v20  ;;  %v6606_v20 = vand.u32 4294901760, %v1084_v27  ;;  %v6638_v2 = vand.u32 4294901760, %v1067_v21 }
  0xe0   : > { %5613 = vmatprep.subr.mxu1 %v1351_v59  ;;  %v6595_v59 = vand.u32 4294901760, %v1069_v11  ;;  %5586 = vmatprep.subr.mxu0 %v6586_v36  ;;  %v1253_v63 = vand.u32 4294901760, %v1252_v15  ;;  %v6646_v18 = vsub.f32 %v1083_v62, %v6628_v40  ;;  %v1081_v62 = vld [vmem:[%s7456_s4 + $0x98] sm:$0xff] }
  0xe1   : > { %5614 = vmatpush3.msra.mxu1 %v1239_v17  ;;  %v6604_v17 = vsub.f32 %v1085_v56, %v6586_v36  ;;  %v1082_v56 = vld [vmem:[%s7456_s4 + $0xa0] sm:$0xff]  ;;  %v6626_v15 = vsub.f32 %v1084_v27, %v6606_v20 }
  0xe2   : > { %5615 = vmatprep.subr.mxu1 %v1358_v28  ;;  %v1259_v28 = vsub.f32 %v6576_v22, %v7478_v46  ;;  %v6616_v29 = vsub.f32 %v1069_v11, %v6595_v59  ;;  %5587 = vmatpush3.msra.mxu0 %v6595_v59  ;;  %v1066_v11 = vld [vmem:[%s7456_s4 + $0x20] sm:$0xff]  ;;  %7559 = vst [vmem:[#allocation11_spill] sm:$0xff] %v6646_v18 }
  0xe3   : > { %5616 = vmatpush3.msra.mxu1 %v1246_v54  ;;  %v7482_v54 = vand.u32 4294901760, %v6604_v17  ;;  %7557 = vst [vmem:[#allocation9_spill] sm:$0xff] %v6626_v15  ;;  %5588 = vmatprep.subr.mxu0 %v6606_v20  ;;  %v7488_v37 = vand.u32 4294901760, %v6626_v15 }
  0xe4   : > { %7556 = vst [vmem:[#allocation8_spill] sm:$0xff] %v6616_v29  ;;  %5617 = vmatprep.subr.mxu1 %v1365_v5  ;;  %v1260_v46 = vand.u32 4294901760, %v1259_v28  ;;  %v7484_v61 = vand.u32 4294901760, %v6616_v29  ;;  %v6636_v5 = vsub.f32 %v1068_v50, %v6618_v32  ;;  %5589 = vmatpush3.msra.mxu0 %v6618_v32  ;;  %v6656_v28 = vsub.f32 %v1067_v21, %v6638_v2  ;;  %v1065_v21 = vld [vmem:[%s7456_s4 + $0x18] sm:$0xff] }
  0xe5   : > { %5618 = vmatpush3.msra.mxu1 %v1253_v63  ;;  %v1378_v27 = vsub.f32 %v6604_v17, %v7482_v54  ;;  %v6648_v63 = vand.u32 4294901760, %v1082_v56  ;;  %5590 = vmatprep.subr.mxu0 %v6628_v40  ;;  %v6658_v54 = vand.u32 4294901760, %v1066_v11 }
  0xe6   : > { %7558 = vst [vmem:[#allocation10_spill] sm:$0xff] %v6636_v5  ;;  %5619 = vmatprep.subr.mxu1 %v1372_v47  ;;  %v1266_v50 = vsub.f32 %v6616_v29, %v7484_v61  ;;  %v7491_v47 = vand.u32 4294901760, %v6636_v5  ;;  %7560 = vst [vmem:[#allocation12_spill] sm:$0xff] %v6656_v28  ;;  %5591 = vmatpush3.msra.mxu0 %v6638_v2  ;;  %v7495_v61 = vand.u32 4294901760, %v6646_v18  ;;  %v7500_v42 = vand.u32 4294901760, %v6656_v28 }
  0xe7   : > { %5620 = vmatpush3.msra.mxu1 %v1260_v46  ;;  %v1379_v8 = vand.u32 4294901760, %v1378_v27  ;;  %v1385_v46 = vsub.f32 %v6626_v15, %v7488_v37  ;;  %v6669_v57 = vsub.f32 %v1082_v56, %v6648_v63  ;;  %5592 = vmatprep.subr.mxu0 %v6648_v63  ;;  %v6680_v37 = vsub.f32 %v1066_v11, %v6658_v54  ;;  %v1080_v56 = vld [vmem:[%s7456_s4 + $0x90] sm:$0xff] }
  0xe8   : > { %v1267_v48 = vand.u32 4294901760, %v1266_v50  ;;  %v1273_v27 = vsub.f32 %v6636_v5, %v7491_v47  ;;  %5593 = vmatpush3.msra.mxu0 %v6658_v54  ;;  %v1392_v50 = vsub.f32 %v6646_v18, %v7495_v61  ;;  %v6690_v47 = vand.u32 4294901760, %v1081_v62  ;;  %v1064_v11 = vld [vmem:[%s7456_s4 + $0x10] sm:$0xff]  ;;  %v1079_v61 = vld [vmem:[%s7456_s4 + $0x88] sm:$0xff] }
  0xe9   : > { %7561 = vst [vmem:[#allocation13_spill] sm:$0xff] %v6669_v57  ;;  %7562 = vst [vmem:[#allocation14_spill] sm:$0xff] %v6680_v37  ;;  %5621 = vmatprep.subr.mxu1 %v1379_v8  ;;  %v1386_v16 = vand.u32 4294901760, %v1385_v46  ;;  %v1280_v6 = vsub.f32 %v6656_v28, %v7500_v42  ;;  %v6699_v46 = vand.u32 4294901760, %v1065_v21  ;;  %v7564_v18 = vand.u32 4294901760, %v6669_v57  ;;  %v1063_v42 = vld [vmem:[%s7456_s4 + $0x8] sm:$0xff] }
  0xea   : > { %5622 = vmatpush3.msra.mxu1 %v1267_v48  ;;  %v1274_v0 = vand.u32 4294901760, %v1273_v27  ;;  %v1393_v7 = vand.u32 4294901760, %v1392_v50  ;;  %v6708_v48 = vsub.f32 %v1081_v62, %v6690_v47  ;;  %v6710_v27 = vand.u32 4294901760, %v1080_v56  ;;  %5594 = vmatprep.subr.mxu0 %v6690_v47  ;;  %v1078_v62 = vld [vmem:[%s7456_s4 + $0x80] sm:$0xff] }
  0xeb   : > { %7563 = vst [vmem:[#allocation15_spill] sm:$0xff] %v6699_v46  ;;  %5623 = vmatprep.subr.mxu1 %v1386_v16  ;;  %v1399_v5 = vsub.f32 %v6669_v57, %v7564_v18  ;;  %v1281_v8 = vand.u32 4294901760, %v1280_v6  ;;  %v7567_v16 = vand.u32 4294901760, %v6680_v37  ;;  %v6720_v28 = vsub.f32 %v1065_v21, %v6699_v46  ;;  %5595 = vmatpush3.msra.mxu0 %v6699_v46  ;;  %v1062_v21 = vld [vmem:[%s7456_s4] sm:$0xff] }
  0xec   : > { %7565 = vst [vmem:[#allocation16_spill] sm:$0xff] %v6708_v48  ;;  %7566 = vst [vmem:[#allocation17_spill] sm:$0xff] %v6710_v27  ;;  %5624 = vmatpush3.msra.mxu1 %v1274_v0  ;;  %v6722_v18 = vand.u32 4294901760, %v1064_v11  ;;  %v7513_v0 = vand.u32 4294901760, %v6708_v48  ;;  %v6730_v6 = vsub.f32 %v1080_v56, %v6710_v27  ;;  %v6732_v15 = vand.u32 4294901760, %v1079_v61  ;;  %5596 = vmatprep.subr.mxu0 %v6710_v27 }
  0xed   : > { %v1287_v50 = vsub.f32 %v6680_v37, %v7567_v16  ;;  %7568 = vst [vmem:[#allocation18_spill] sm:$0xff] %v6720_v28  ;;  %5625 = vmatprep.subr.mxu1 %v1393_v7  ;;  %v1400_v57 = vand.u32 4294901760, %v1399_v5  ;;  %v7518_v37 = vand.u32 4294901760, %v6720_v28  ;;  %v6742_v5 = vand.u32 4294901760, %v1063_v42 }
  0xee   : > { %7569 = vst [vmem:[#allocation19_spill] sm:$0xff] %v6722_v18  ;;  %7570 = vst [vmem:[#allocation20_spill] sm:$0xff] %v6730_v6  ;;  %5626 = vmatpush3.msra.mxu1 %v1281_v8  ;;  %v6740_v7 = vsub.f32 %v1064_v11, %v6722_v18  ;;  %5597 = vmatpush3.msra.mxu0 %v6722_v18  ;;  %v1406_v56 = vsub.f32 %v6708_v48, %v7513_v0  ;;  %v7521_v46 = vand.u32 4294901760, %v6730_v6 }
  0xef   : > { %7571 = vst [vmem:[#allocation21_spill] sm:$0xff] %v6732_v15  ;;  %v1288_v16 = vand.u32 4294901760, %v1287_v50  ;;  %7573 = vst [vmem:[#allocation23_spill] sm:$0xff] %v6742_v5  ;;  %5627 = vmatprep.subr.mxu1 %v1400_v57  ;;  %v6750_v27 = vsub.f32 %v1079_v61, %v6732_v15  ;;  %v6752_v8 = vand.u32 4294901760, %v1078_v62  ;;  %5598 = vmatprep.subr.mxu0 %v6732_v15  ;;  %v6762_v0 = vand.u32 4294901760, %v1062_v21 }
  0xf0   : > { %7572 = vst [vmem:[#allocation22_spill] sm:$0xff] %v6740_v7  ;;  %v1294_v11 = vsub.f32 %v6720_v28, %v7518_v37  ;;  %v7524_v57 = vand.u32 4294901760, %v6740_v7  ;;  %v6760_v50 = vsub.f32 %v1063_v42, %v6742_v5  ;;  %5599 = vmatpush3.msra.mxu0 %v6742_v5  ;;  %v1407_v61 = vand.u32 4294901760, %v1406_v56 }
  0xf1   : > { %7574 = vst [vmem:[#allocation24_spill] sm:$0xff] %v6750_v27  ;;  %7575 = vst [vmem:[#allocation25_spill] sm:$0xff] %v6752_v8  ;;  %5628 = vmatpush3.msra.mxu1 %v1288_v16  ;;  %v1413_v48 = vsub.f32 %v6730_v6, %v7521_v46  ;;  %v7527_v16 = vand.u32 4294901760, %v6750_v27  ;;  %v6770_v15 = vsub.f32 %v1078_v62, %v6752_v8  ;;  %5600 = vmatprep.subr.mxu0 %v6752_v8 }
  0xf2   : > { %7576 = vst [vmem:[#allocation26_spill] sm:$0xff] %v6760_v50  ;;  %7577 = vst [vmem:[#allocation27_spill] sm:$0xff] %v6762_v0  ;;  %v1295_v37 = vand.u32 4294901760, %v1294_v11  ;;  %v1301_v42 = vsub.f32 %v6740_v7, %v7524_v57  ;;  %v7528_v28 = vand.u32 4294901760, %v6760_v50  ;;  %v6778_v56 = vsub.f32 %v1062_v21, %v6762_v0  ;;  %5601 = vmatpush3.msra.mxu0 %v6762_v0 }
  0xf3   : > { %7578 = vst [vmem:[#allocation28_spill] sm:$0xff] %v6770_v15  ;;  %5629 = vmatprep.subr.mxu1 %v1407_v61  ;;  %v1414_v46 = vand.u32 4294901760, %v1413_v48  ;;  %v1420_v62 = vsub.f32 %v6750_v27, %v7527_v16  ;;  %v7532_v6 = vand.u32 4294901760, %v6770_v15  ;;  %5640 = vmatprep.subr.mxu0 %v6393_v51 }
  0xf4   : > { %7579 = vst [vmem:[#allocation29_spill] sm:$0xff] %v6778_v56  ;;  %5630 = vmatpush3.msra.mxu1 %v1295_v37  ;;  %v1302_v11 = vand.u32 4294901760, %v1301_v42  ;;  %v1308_v57 = vsub.f32 %v6760_v50, %v7528_v28  ;;  %v7539_v21 = vand.u32 4294901760, %v6778_v56 }
  0xf5   : > { %5631 = vmatprep.subr.mxu1 %v1414_v46  ;;  %v1421_v7 = vand.u32 4294901760, %v1420_v62  ;;  %v1427_v48 = vsub.f32 %v6770_v15, %v7532_v6  ;;  %v479_v62 = vpop.permute.xlu0 %478 }
  0xf6   : > { %5632 = vmatpush3.msra.mxu1 %v1302_v11  ;;  %v1309_v61 = vand.u32 4294901760, %v1308_v57  ;;  %v1315_v16 = vsub.f32 %v6778_v56, %v7539_v21 }
  0xf7   : > { %5633 = vmatprep.subr.mxu1 %v1421_v7  ;;  %v1428_v37 = vand.u32 4294901760, %v1427_v48 }
  0xf8   : > { %5634 = vmatpush3.msra.mxu1 %v1309_v61  ;;  %v1316_v42 = vand.u32 4294901760, %v1315_v16 }
  0xf9   : > { %5635 = vmatprep.subr.mxu1 %v1428_v37 }
  0xfa   : > { %5636 = vmatpush3.msra.mxu1 %v1316_v42 }
  0xfb   : > { %5675 = vmatprep.subr.mxu1 %v6382_v24 }
 0x171   : > { %v572_v46 = vpop.f32.mrf.mxu0 }
 0x172   : > { %v573_v50 = vadd.f32 %v572_v46, %v479_v62 }
 0x173   : > { %v574_v28 = vpop.f32.mrf.mxu0 }
 0x174   : > { %v575_v6 = vadd.f32 %v574_v28, %v479_v62 }
 0x179   : > { %v694_v51 = vpop.f32.mrf.mxu1 }
 0x17a   : > { %v695_v15 = vadd.f32 %v694_v51, %v573_v50  ;;  %v7580_v50 = vld [vmem:[#allocation8_spill] sm:$0xff] }
 0x17b   : > { %v696_v11 = vpop.f32.mrf.mxu1  ;;  %v787_v57 = vpop.f32.mrf.mxu0 }
 0x17c   : > { %v697_v0 = vadd.f32 %v696_v11, %v575_v6  ;;  %v788_v7 = vadd.f32 %v787_v57, %v695_v15  ;;  %v7583_v11 = vld [vmem:[#allocation17_spill] sm:$0xff]  ;;  %v7584_v57 = vld [vmem:[#allocation10_spill] sm:$0xff] }
 0x17d   : > { %v789_v21 = vpop.f32.mrf.mxu0 }
 0x17e   : > { %v790_v16 = vadd.f32 %v789_v21, %v697_v0  ;;  %v7582_v21 = vld [vmem:[#allocation9_spill] sm:$0xff] }
 0x184   : > { %v871_v27 = vpop.f32.mrf.mxu1 }
 0x185   : > { %v872_v37 = vadd.f32 %v871_v27, %v788_v7  ;;  %v7585_v7 = vld [vmem:[#allocation19_spill] sm:$0xff] }
 0x186   : > { %v873_v48 = vpop.f32.mrf.mxu1 }
 0x187   : > { %v973_v61 = vpop.f32.mrf.mxu0  ;;  %v874_v42 = vadd.f32 %v873_v48, %v790_v16  ;;  %v7586_v48 = vld [vmem:[#allocation11_spill] sm:$0xff]  ;;  %v7588_v16 = vld [vmem:[#allocation12_spill] sm:$0xff] }
 0x188   : > { %v974_v24 = vadd.f32 %v973_v61, %v872_v37  ;;  %v7587_v61 = vld [vmem:[#allocation21_spill] sm:$0xff]  ;;  %v7589_v37 = vld [vmem:[#allocation23_spill] sm:$0xff] }
 0x189   : > { %v975_v56 = vpop.f32.mrf.mxu0 }
 0x18a   : > { %v976_v5 = vadd.f32 %v975_v56, %v874_v42  ;;  %v7581_v56 = vld [vmem:[#allocation15_spill] sm:$0xff]  ;;  %v7590_v42 = vld [vmem:[#allocation13_spill] sm:$0xff] }
 0x190   : > { %v1055_v8 = vpop.f32.mrf.mxu1 }
 0x191   : > { %v1056_v18 = vadd.f32 %v1055_v8, %v974_v24 }
 0x192   : > { %v1057_v29 = vpop.f32.mrf.mxu1 }
 0x193   : > { %v1060_v46 = vmax.f32 %v1056_v18, 0.0  ;;  %v1058_v28 = vadd.f32 %v1057_v29, %v976_v5 }
 0x195   : > { %v6797_v62 = vand.u32 4294901760, %v1060_v46  ;;  %v1061_v51 = vmax.f32 %v1058_v28, 0.0  ;;  %v7592_v28 = vld [vmem:[#allocation14_spill] sm:$0xff] }
 0x197   : > { %v6800_v6 = vsub.f32 %v1060_v46, %v6797_v62  ;;  %v6802_v15 = vand.u32 4294901760, %v1061_v51  ;;  %v7591_v46 = vld [vmem:[#allocation25_spill] sm:$0xff] }
 0x199   : > { %v1198_v0 = vand.u32 4294901760, %v6800_v6  ;;  %v1191_v27 = vsub.f32 %v1061_v51, %v6802_v15  ;;  %1431 = vmatprep.mubr.f32.mxu1 %v6802_v15  ;;  %v7593_v51 = vld [vmem:[#allocation27_spill] sm:$0xff] }
 0x19a   : > { %1433 = vmatmul.mubr.f32.vlgmr.msra.gmra.mxu1 %v6797_v62 }
 0x19b   : > { %5676 = vmatpush3.msra.mxu1 %v6387_v34  ;;  %v1192_v24 = vand.u32 4294901760, %v1191_v27  ;;  %v1199_v29 = vsub.f32 %v6800_v6, %v1198_v0 }
 0x19c   : > { %5677 = vmatprep.subr.mxu1 %v6395_v35 }
 0x19d   : > { %5678 = vmatpush3.msra.mxu1 %v6404_v60  ;;  %1675 = vmatprep.mubr.f32.mxu1 %v1192_v24  ;;  %v1193_v18 = vsub.f32 %v1191_v27, %v1192_v24  ;;  %v1200_v8 = vand.u32 4294901760, %v1199_v29  ;;  %v7595_v24 = vld [vmem:[#allocation6_spill] sm:$0xff] }
 0x19e   : > { %5679 = vmatprep.subr.mxu1 %v6414_v3  ;;  %v7596_v29 = vld [vmem:[#allocation18_spill] sm:$0xff] }
 0x19f   : > { %5680 = vmatpush3.msra.mxu1 %v6424_v13  ;;  %v1194_v5 = vand.u32 4294901760, %v1193_v18  ;;  %v7597_v18 = vld [vmem:[#allocation20_spill] sm:$0xff] }
 0x1a0   : > { %5681 = vmatprep.subr.mxu1 %v6437_v39 }
 0x1a1   : > { %5682 = vmatpush3.msra.mxu1 %v6450_v44  ;;  %1195 = vmatprep.mubr.f32.mxu0 %v1194_v5  ;;  %v7598_v5 = vld [vmem:[#allocation22_spill] sm:$0xff] }
 0x1a2   : > { %5683 = vmatprep.subr.mxu1 %v6482_v9  ;;  %1201 = vmatmul.mubr.f32.vlgmr.msra.gmra.mxu0 %v1200_v8  ;;  %v7599_v8 = vld [vmem:[#allocation24_spill] sm:$0xff] }
 0x1a3   : > { %5641 = vmatpush3.msra.mxu0 %v6402_v55  ;;  %5684 = vmatpush3.msra.mxu1 %v6491_v19 }
 0x1a4   : > { %5642 = vmatprep.subr.mxu0 %v6412_v1  ;;  %1568 = vmatprep.mubr.f32.mxu0 %v1191_v27  ;;  %v7594_v27 = vld [vmem:[#allocation16_spill] sm:$0xff] }
 0x1a5   : > { %5685 = vmatprep.subr.mxu1 %v6502_v26  ;;  %5643 = vmatpush3.msra.mxu0 %v6422_v12 }
 0x1a6   : > { %5686 = vmatpush3.msra.mxu1 %v6514_v31  ;;  %5644 = vmatprep.subr.mxu0 %v6435_v38 }
 0x1a7   : > { %5687 = vmatprep.subr.mxu1 %v6524_v33  ;;  %5645 = vmatpush3.msra.mxu0 %v6448_v43 }
 0x1a8   : > { %5688 = vmatpush3.msra.mxu1 %v6534_v14  ;;  %5646 = vmatprep.subr.mxu0 %v6461_v49 }
 0x1a9   : > { %5689 = vmatprep.subr.mxu1 %v6544_v45  ;;  %5647 = vmatpush3.msra.mxu0 %v6472_v58 }
 0x1aa   : > { %5690 = vmatpush3.msra.mxu1 %v6554_v53  ;;  %5648 = vmatprep.subr.mxu0 %v6500_v25 }
 0x1ab   : > { %5691 = vmatprep.subr.mxu1 %v6586_v36  ;;  %5649 = vmatpush3.msra.mxu0 %v6512_v30 }
 0x1ac   : > { %5692 = vmatpush3.msra.mxu1 %v6595_v59  ;;  %5650 = vmatprep.subr.mxu0 %v6522_v23 }
 0x1ad   : > { %5693 = vmatprep.subr.mxu1 %v6606_v20  ;;  %5651 = vmatpush3.msra.mxu0 %v6532_v4 }
 0x1ae   : > { %5694 = vmatpush3.msra.mxu1 %v6618_v32  ;;  %5652 = vmatprep.subr.mxu0 %v6542_v41 }
 0x1af   : > { %5695 = vmatprep.subr.mxu1 %v6628_v40  ;;  %5653 = vmatpush3.msra.mxu0 %v6552_v52 }
 0x1b0   : > { %5696 = vmatpush3.msra.mxu1 %v6638_v2  ;;  %5654 = vmatprep.subr.mxu0 %v6565_v10 }
 0x1b1   : > { %5697 = vmatprep.subr.mxu1 %v6648_v63  ;;  %5655 = vmatpush3.msra.mxu0 %v6576_v22 }
 0x1b2   : > { %5698 = vmatpush3.msra.mxu1 %v6658_v54  ;;  %5656 = vmatprep.subr.mxu0 %v6604_v17 }
 0x1b3   : > { %5699 = vmatprep.subr.mxu1 %v6690_v47  ;;  %5657 = vmatpush3.msra.mxu0 %v7580_v50 }
 0x1b4   : > { %5700 = vmatpush3.msra.mxu1 %v7581_v56  ;;  %5658 = vmatprep.subr.mxu0 %v7582_v21 }
 0x1b5   : > { %5701 = vmatprep.subr.mxu1 %v7583_v11  ;;  %5659 = vmatpush3.msra.mxu0 %v7584_v57 }
 0x1b6   : > { %5702 = vmatpush3.msra.mxu1 %v7585_v7  ;;  %5660 = vmatprep.subr.mxu0 %v7586_v48 }
 0x1b7   : > { %5703 = vmatprep.subr.mxu1 %v7587_v61  ;;  %5661 = vmatpush3.msra.mxu0 %v7588_v16 }
 0x1b8   : > { %5704 = vmatpush3.msra.mxu1 %v7589_v37  ;;  %5662 = vmatprep.subr.mxu0 %v7590_v42 }
 0x1b9   : > { %5705 = vmatprep.subr.mxu1 %v7591_v46  ;;  %5663 = vmatpush3.msra.mxu0 %v7592_v28 }
 0x1ba   : > { %5706 = vmatpush3.msra.mxu1 %v7593_v51  ;;  %5664 = vmatprep.subr.mxu0 %v7594_v27 }
 0x1bb   : > { %1679 = vmatmul.mubr.f32.vlgmr.msra.gmra.mxu1 %v1198_v0  ;;  %5745 = vmatprep.subr.mxu1 %v7595_v24  ;;  %v7600_v0 = vld [vmem:[#allocation26_spill] sm:$0xff]  ;;  %v7601_v24 = vld [vmem:[#allocation28_spill] sm:$0xff] }
 0x1bc   : > { %5665 = vmatpush3.msra.mxu0 %v7596_v29  ;;  %5746 = vmatpush3.msra.mxu1 %v6387_v34  ;;  %v7602_v34 = vld [vmem:[#allocation29_spill] sm:$0xff] }
 0x1bd   : > { %1949 = vmatprep.mubr.f32.mxu1 %v6802_v15  ;;  %5666 = vmatprep.subr.mxu0 %v7597_v18 }
 0x1be   : > { %5747 = vmatprep.subr.mxu1 %v6395_v35  ;;  %5667 = vmatpush3.msra.mxu0 %v7598_v5  ;;  %v7603_v35 = vld [vmem:[#allocation7_spill] sm:$0xff] }
 0x1bf   : > { %5748 = vmatpush3.msra.mxu1 %v6404_v60  ;;  %5668 = vmatprep.subr.mxu0 %v7599_v8  ;;  %v7604_v60 = vand.u32 4294901760, %v7603_v35 }
 0x1c0   : > { %5749 = vmatprep.subr.mxu1 %v6414_v3  ;;  %5669 = vmatpush3.msra.mxu0 %v7600_v0  ;;  %v7605_v3 = vand.u32 4294901760, %v6402_v55  ;;  %v7609_v55 = vand.u32 4294901760, %v6448_v43  ;;  %v7613_v43 = vand.u32 4294901760, %v6512_v30  ;;  %v7620_v30 = vand.u32 4294901760, %v6604_v17 }
 0x1c1   : > { %5750 = vmatpush3.msra.mxu1 %v6424_v13  ;;  %5670 = vmatprep.subr.mxu0 %v7601_v24  ;;  %v7606_v13 = vand.u32 4294901760, %v6412_v1  ;;  %v7610_v1 = vand.u32 4294901760, %v6461_v49  ;;  %v7614_v49 = vand.u32 4294901760, %v6522_v23  ;;  %v7622_v23 = vand.u32 4294901760, %v7582_v21 }
 0x1c2   : > { %5751 = vmatprep.subr.mxu1 %v6437_v39  ;;  %5671 = vmatpush3.msra.mxu0 %v7602_v34  ;;  %v7607_v39 = vand.u32 4294901760, %v6422_v12  ;;  %v7611_v12 = vand.u32 4294901760, %v6472_v58  ;;  %v7615_v58 = vand.u32 4294901760, %v6532_v4  ;;  %v7624_v4 = vand.u32 4294901760, %v7586_v48 }
 0x1c3   : > { %5752 = vmatpush3.msra.mxu1 %v6450_v44  ;;  %1571 = vmatmul.mubr.f32.vlgmr.msra.gmra.mxu0 %v6800_v6  ;;  %v7608_v44 = vand.u32 4294901760, %v6435_v38  ;;  %v7612_v38 = vand.u32 4294901760, %v6500_v25  ;;  %v7618_v25 = vand.u32 4294901760, %v6565_v10  ;;  %v7631_v10 = vmov 0.0  }
 0x1c4   : > { %5710 = vmatprep.subr.mxu0 %v7604_v60  ;;  %5753 = vmatprep.subr.mxu1 %v6482_v9  ;;  %v7616_v9 = vand.u32 4294901760, %v6542_v41  ;;  %v7627_v41 = vand.u32 4294901760, %v7592_v28  ;;  %v7636_v17 = vand.u32 4294901760, %v7602_v34 }
 0x1c5   : > { %5711 = vmatpush3.msra.mxu0 %v7605_v3  ;;  %1845 = vmatprep.mubr.f32.mxu0 %v6802_v15 }
 0x1c6   : > { %5754 = vmatpush3.msra.mxu1 %v6491_v19  ;;  %5712 = vmatprep.subr.mxu0 %v7606_v13  ;;  %v7617_v19 = vand.u32 4294901760, %v6552_v52  ;;  %v7629_v52 = vand.u32 4294901760, %v7596_v29 }
 0x1c7   : > { %5755 = vmatprep.subr.mxu1 %v6502_v26  ;;  %5713 = vmatpush3.msra.mxu0 %v7607_v39  ;;  %v7619_v26 = vand.u32 4294901760, %v6576_v22  ;;  %v7632_v22 = vand.u32 4294901760, %v7598_v5 }
 0x1c8   : > { %5756 = vmatpush3.msra.mxu1 %v6514_v31  ;;  %5714 = vmatprep.subr.mxu0 %v7608_v44  ;;  %v7621_v31 = vand.u32 4294901760, %v7580_v50 }
 0x1c9   : > { %5757 = vmatprep.subr.mxu1 %v6524_v33  ;;  %5715 = vmatpush3.msra.mxu0 %v7609_v55  ;;  %v7623_v33 = vand.u32 4294901760, %v7584_v57  ;;  %v361_v55 = vld [vmem:[%s7460_s8] sm:$0xff] }
 0x1ca   : > { %5758 = vmatpush3.msra.mxu1 %v6534_v14  ;;  %5716 = vmatprep.subr.mxu0 %v7610_v1  ;;  %v7625_v14 = vand.u32 4294901760, %v7588_v16 }
 0x1cb   : > { %5759 = vmatprep.subr.mxu1 %v6544_v45  ;;  %5717 = vmatpush3.msra.mxu0 %v7611_v12  ;;  %v7628_v45 = vand.u32 4294901760, %v7594_v27  ;;  %v1957_v12 = vpop.permute.xlu1 %1956 }
 0x1cc   : > { %5760 = vmatpush3.msra.mxu1 %v6554_v53  ;;  %5718 = vmatprep.subr.mxu0 %v7612_v38  ;;  %v7630_v53 = vand.u32 4294901760, %v7597_v18 }
 0x1cd   : > { %5761 = vmatprep.subr.mxu1 %v6586_v36  ;;  %5719 = vmatpush3.msra.mxu0 %v7613_v43  ;;  %v7634_v36 = vand.u32 4294901760, %v7600_v0 }
 0x1ce   : > { %5762 = vmatpush3.msra.mxu1 %v6595_v59  ;;  %5720 = vmatprep.subr.mxu0 %v7614_v49  ;;  %v7635_v59 = vand.u32 4294901760, %v7601_v24 }
 0x1cf   : > { %5763 = vmatprep.subr.mxu1 %v6606_v20  ;;  %5721 = vmatpush3.msra.mxu0 %v7615_v58 }
 0x1d0   : > { %5764 = vmatpush3.msra.mxu1 %v6618_v32  ;;  %5722 = vmatprep.subr.mxu0 %v7616_v9  ;;  %v7633_v32 = vand.u32 4294901760, %v7599_v8 }
 0x1d1   : > { %5765 = vmatprep.subr.mxu1 %v6628_v40  ;;  %5723 = vmatpush3.msra.mxu0 %v7617_v19  ;;  %v7626_v40 = vand.u32 4294901760, %v7590_v42 }
 0x1d2   : > { %5766 = vmatpush3.msra.mxu1 %v6638_v2  ;;  %5724 = vmatprep.subr.mxu0 %v7618_v25 }
 0x1d3   : > { %5767 = vmatprep.subr.mxu1 %v6648_v63  ;;  %5725 = vmatpush3.msra.mxu0 %v7619_v26  ;;  %v356_v63 = vld [vmem:[%s7459_s7] sm:$0xf] }
 0x1d4   : > { %5768 = vmatpush3.msra.mxu1 %v6658_v54  ;;  %5726 = vmatprep.subr.mxu0 %v7620_v30 }
 0x1d5   : > { %5769 = vmatprep.subr.mxu1 %v6690_v47  ;;  %5727 = vmatpush3.msra.mxu0 %v7621_v31 }
 0x1d6   : > { %5770 = vmatpush3.msra.mxu1 %v7581_v56  ;;  %5728 = vmatprep.subr.mxu0 %v7622_v23 }
 0x1d7   : > { %5771 = vmatprep.subr.mxu1 %v7583_v11  ;;  %5729 = vmatpush3.msra.mxu0 %v7623_v33 }
 0x1d8   : > { %5772 = vmatpush3.msra.mxu1 %v7585_v7  ;;  %5730 = vmatprep.subr.mxu0 %v7624_v4 }
 0x1d9   : > { %5773 = vmatprep.subr.mxu1 %v7587_v61  ;;  %5731 = vmatpush3.msra.mxu0 %v7625_v14 }
 0x1da   : > { %5774 = vmatpush3.msra.mxu1 %v7589_v37  ;;  %5732 = vmatprep.subr.mxu0 %v7626_v40 }
 0x1db   : > { %5775 = vmatprep.subr.mxu1 %v7591_v46  ;;  %5733 = vmatpush3.msra.mxu0 %v7627_v41 }
 0x1dc   : > { %5776 = vmatpush3.msra.mxu1 %v7593_v51  ;;  %5734 = vmatprep.subr.mxu0 %v7628_v45 }
 0x1dd   : > { %1951 = vmatmul.mubr.f32.vlgmr.msra.gmra.mxu1 %v6797_v62  ;;  %5735 = vmatpush3.msra.mxu0 %v7629_v52 }
 0x1de   : > { %5736 = vmatprep.subr.mxu0 %v7630_v53  ;;  %5809 = vmatprep.subr.mxu1 %v7631_v10 }
 0x1df   : > { %5737 = vmatpush3.msra.mxu0 %v7632_v22  ;;  %5811 = vmatprep.mubr.msk.f32.mxu1 %vm6001_vm10, %v7631_v10  ;;  %v357_v22 = vld [vmem:[%s7459_s7 + $0x4] sm:$0xff] }
 0x1e0   : > { %5738 = vmatprep.subr.mxu0 %v7633_v32  ;;  %2419 = vrot.lane.b32.xlu1 %v361_v55, %s6002_s22  ;;  %v2423_v32 = vsel %vm1959_vm11, %v357_v22, 0  ;;  %s7640_s22 = smov 15  }
 0x1e1   : > { %5739 = vmatpush3.msra.mxu0 %v7634_v36 }
 0x1e2   : > { %5740 = vmatprep.subr.mxu0 %v7635_v59 }
 0x1e3   : > { %5741 = vmatpush3.msra.mxu0 %v7636_v17  ;;  %v2494_v17 = vand.u32 4294901760, %v2423_v32 }
 0x1e4   : > { %1847 = vmatmul.mubr.f32.vlgmr.msra.gmra.mxu0 %v6797_v62  ;;  %5804 = vmatprep.subr.mxu0 %v7631_v10  ;;  %v1961_v62 = vsel %vm1959_vm11, %v356_v63, 0 }
 0x1e5   : > { %5806 = vmatprep.mubr.msk.f32.mxu0 %vm6001_vm10, %v7631_v10  ;;  %v2032_v21 = vand.u32 4294901760, %v1961_v62 }
 0x1e7   : > { %v2033_v61 = vsub.f32 %v1961_v62, %v2032_v21 }
 0x1e9   : > { %v2034_v28 = vand.u32 4294901760, %v2033_v61 }
 0x1eb   : > { %v2035_v0 = vsub.f32 %v2033_v61, %v2034_v28 }
 0x1ed   : > { %v2036_v35 = vand.u32 4294901760, %v2035_v0 }
 0x25a   : > { %v5637_v54 = vpop.f32.mrf.mxu1 }
 0x25c   : > { %v5638_v6 = vpop.f32.mrf.mxu1 }
 0x25d   : > { %v5639_v11 = vadd.f32 %v5638_v6, %v5637_v54 }
 0x262   : > { %v5602_v20 = vpop.f32.mrf.mxu0 }
 0x264   : > { %v5603_v2 = vpop.f32.mrf.mxu0 }
 0x265   : > { %v5604_v56 = vadd.f32 %v5603_v2, %v5602_v20  ;;  %v2495_v20 = vsub.f32 %v2423_v32, %v2494_v17 }
 0x267   : > { %v1435_v48 = vadd.f32 %v5639_v11, %v5604_v56  ;;  %v2496_v54 = vand.u32 4294901760, %v2495_v20  ;;  %v7637_v11 = vlaneseq }
 0x269   : > { %v2497_v2 = vsub.f32 %v2495_v20, %v2496_v54 }
 0x26b   : > { %v2498_v6 = vand.u32 4294901760, %v2497_v2  ;;  %v358_v2 = vld [vmem:[%s7459_s7 + $0xc] sm:$0xf] }
 0x27b   : > { %v5707_v15 = vpop.f32.mrf.mxu1 }
 0x27d   : > { %v5708_v7 = vpop.f32.mrf.mxu1 }
 0x27e   : > { %v5709_v46 = vadd.f32 %v5708_v7, %v5707_v15 }
 0x283   : > { %v5672_v47 = vpop.f32.mrf.mxu0 }
 0x285   : > { %v5673_v50 = vpop.f32.mrf.mxu0 }
 0x286   : > { %v5674_v57 = vadd.f32 %v5673_v50, %v5672_v47 }
 0x288   : > { %v1573_v37 = vadd.f32 %v5674_v57, %v1435_v48  ;;  %v2877_v57 = vshrl.u32 %v7637_v11, 7  ;;  %v2874_v48 = vld [vmem:[%s7457_s5] sm:$0x3] }
 0x28a   : > { %v1681_v29 = vadd.f32 %v5709_v46, %v1573_v37  ;;  %v2882_v7 = vsub.s32 1, %v2877_v57 }
 0x29d   : > { %v5777_v16 = vpop.f32.mrf.mxu1 }
 0x29f   : > { %v5778_v51 = vpop.f32.mrf.mxu1 }
 0x2a0   : > { %v5779_v5 = vadd.f32 %v5778_v51, %v5777_v16  ;;  %v2883_v16 = vrot.slane %v2874_v48, %v2882_v7 }
 0x2a4   : > { %v5742_v42 = vpop.f32.mrf.mxu0 }
 0x2a6   : > { %v5743_v27 = vpop.f32.mrf.mxu0 }
 0x2a7   : > { %v5744_v18 = vadd.f32 %v5743_v27, %v5742_v42  ;;  %v2891_v42 = vsel %vm2888_vm12, %v2883_v16, 0 }
 0x2a9   : > { %v1849_v8 = vadd.f32 %v5744_v18, %v1681_v29 }
 0x2ab   : > { %v1953_v24 = vadd.f32 %v5779_v5, %v1849_v8 }
 0x2ad   : > { %v1964_v34 = vsel %vm457_vm1, %v1953_v24, 0 }
 0x2ae   : > { %v1997_v60 = vand.u32 4294901760, %v1964_v34 }
 0x2b0   : > { %5805 = vmatpush3.msra.mxu0 %v1997_v60  ;;  %v2074_v3 = vsub.f32 %v1964_v34, %v1997_v60 }
 0x2b1   : > { %5807 = vmatmul.mubr.f32.vlgmr.msra.gmra.mxu0 %v2036_v35  ;;  %5814 = vmatprep.subr.mxu0 %v7631_v10 }
 0x2b2   : > { %5815 = vmatpush3.msra.mxu0 %v2074_v3  ;;  %5816 = vmatprep.mubr.msk.f32.mxu0 %vm6001_vm10, %v7631_v10  ;;  %v2075_v13 = vand.u32 4294901760, %v2074_v3 }
 0x2b3   : > { %5824 = vmatprep.subr.mxu0 %v7631_v10 }
 0x2b4   : > { %v2076_v39 = vsub.f32 %v2074_v3, %v2075_v13 }
 0x2b5   : > { %5817 = vmatmul.mubr.f32.vlgmr.msra.gmra.mxu0 %v2033_v61  ;;  %v2878_v61 = vsub.s32 0, %v2877_v57 }
 0x2b6   : > { %5825 = vmatpush3.msra.mxu0 %v2075_v13  ;;  %v2077_v44 = vand.u32 4294901760, %v2076_v39  ;;  %5826 = vmatprep.mubr.msk.f32.mxu0 %vm6001_vm10, %v7631_v10 }
 0x2b7   : > { %5834 = vmatprep.subr.mxu0 %v7631_v10  ;;  %v2879_v37 = vrot.slane %v2874_v48, %v2878_v61 }
 0x2b8   : > { %5810 = vmatpush3.msra.mxu1 %v2077_v44 }
 0x2b9   : > { %5812 = vmatmul.mubr.f32.vlgmr.msra.gmra.mxu1 %v2032_v21  ;;  %5819 = vmatprep.subr.mxu1 %v7631_v10  ;;  %v2889_v46 = vsel %vm2888_vm12, %v2879_v37, 0 }
 0x2ba   : > { %5820 = vmatpush3.msra.mxu1 %v1997_v60  ;;  %5821 = vmatprep.mubr.msk.f32.mxu1 %vm6001_vm10, %v7631_v10  ;;  %v7036_v51 = vand.u32 4294901760, %v2889_v46 }
 0x2bb   : > { %5829 = vmatprep.subr.mxu1 %v7631_v10  ;;  %5827 = vmatmul.mubr.f32.vlgmr.msra.gmra.mxu0 %v2032_v21 }
 0x2bc   : > { %5836 = vmatprep.mubr.msk.f32.mxu0 %vm6001_vm10, %v7631_v10  ;;  %v7043_v29 = vsub.f32 %v2889_v46, %v7036_v51 }
 0x2bd   : > { %5822 = vmatmul.mubr.f32.vlgmr.msra.gmra.mxu1 %v2034_v28  ;;  %v7034_v28 = vand.u32 4294901760, %v2891_v42 }
 0x2be   : > { %5830 = vmatpush3.msra.mxu1 %v1997_v60  ;;  %5831 = vmatprep.mubr.msk.f32.mxu1 %vm6001_vm10, %v7631_v10  ;;  %v7051_v5 = vand.u32 4294901760, %v7043_v29  ;;  %v2420_v60 = vpop.permute.xlu1 %2419 }
 0x2bf   : > { %5839 = vmatprep.subr.mxu1 %v7631_v10  ;;  %v7039_v27 = vsub.f32 %v2891_v42, %v7034_v28 }
 0x2c0   : > { %v3010_v0 = vsub.f32 %v7043_v29, %v7051_v5 }
 0x2c1   : > { %5832 = vmatmul.mubr.f32.vlgmr.msra.gmra.mxu1 %v2032_v21  ;;  %v7047_v18 = vand.u32 4294901760, %v7039_v27 }
 0x2c2   : > { %5841 = vmatprep.mubr.msk.f32.mxu1 %vm6001_vm10, %v7631_v10  ;;  %v3011_v34 = vand.u32 4294901760, %v3010_v0 }
 0x2c3   : > { %v3004_v8 = vsub.f32 %v7039_v27, %v7047_v18 }
 0x2c5   : > { %v3005_v24 = vand.u32 4294901760, %v3004_v8 }
 0x371   : > { %v2038_v1 = vpop.f32.mrf.mxu0 }
 0x372   : > { %v2039_v49 = vadd.f32 %v2038_v1, %v1957_v12 }
 0x373   : > { %v5808_v38 = vpop.f32.mrf.mxu0 }
 0x375   : > { %v2188_v43 = vpop.f32.mrf.mxu0 }
 0x377   : > { %v5818_v58 = vpop.f32.mrf.mxu0 }
 0x379   : > { %v2114_v9 = vpop.f32.mrf.mxu1 }
 0x37a   : > { %v2115_v19 = vadd.f32 %v2114_v9, %v2039_v49 }
 0x37b   : > { %v5813_v25 = vpop.f32.mrf.mxu1  ;;  %v2336_v26 = vpop.f32.mrf.mxu0 }
 0x37c   : > { %v2189_v30 = vadd.f32 %v2188_v43, %v2115_v19 }
 0x37d   : > { %v2262_v31 = vpop.f32.mrf.mxu1  ;;  %v5828_v23 = vpop.f32.mrf.mxu0 }
 0x37e   : > { %v2263_v33 = vadd.f32 %v2262_v31, %v2189_v30 }
 0x37f   : > { %v5823_v4 = vpop.f32.mrf.mxu1 }
 0x380   : > { %v2337_v14 = vadd.f32 %v2336_v26, %v2263_v33 }
 0x381   : > { %v2408_v40 = vpop.f32.mrf.mxu1 }
 0x382   : > { %v2409_v41 = vadd.f32 %v2408_v40, %v2337_v14 }
 0x383   : > { %v5833_v45 = vpop.f32.mrf.mxu1 }
 0x384   : > { %v2412_v52 = vsub.f32 0.0, %v2409_v41 }
 0x386   : > { %v2413_v53 = vmul.f32 1.442695, %v2412_v52 }
 0x388   : > { %5924 = vpow2.f32 %v2413_v53 }
 0x395   : > { %v5925_v36 = vpop.eup %5924 }
 0x396   : > { %v2415_v59 = vadd.f32 1.0, %v5925_v36 }
 0x398   : > { %5926 = vrcp.f32 %v2415_v59  ;;  %v6003_v59 = vmov 3  }
 0x399   : > { %5919 = vset.pattern.permute.xlu0 %v6003_v59 }
 0x3a5   : > { %v7012_v63 = vpop.eup %5926 }
 0x3a6   : > { %v2426_v47 = vsel %vm457_vm1, %v7012_v63, 0  ;;  %v3358_v4 = vsel %vm2884_vm13, %v7012_v63, 0 }
 0x3a7   : > { %v2459_v62 = vand.u32 4294901760, %v2426_v47  ;;  %v3427_v40 = vand.u32 4294901760, %v3358_v4 }
 0x3a9   : > { %5835 = vmatpush3.msra.mxu0 %v2459_v62  ;;  %v2536_v15 = vsub.f32 %v2426_v47, %v2459_v62  ;;  %v3428_v52 = vsub.f32 %v3358_v4, %v3427_v40 }
 0x3aa   : > { %5837 = vmatmul.mubr.f32.vlgmr.msra.gmra.mxu0 %v2498_v6  ;;  %5844 = vmatprep.subr.mxu0 %v7631_v10  ;;  %v3833_v6 = vsel %vm3831_vm14, %v358_v2, 0 }
 0x3ab   : > { %5845 = vmatpush3.msra.mxu0 %v2536_v15  ;;  %5846 = vmatprep.mubr.msk.f32.mxu0 %vm6001_vm10, %v7631_v10  ;;  %v2537_v50 = vand.u32 4294901760, %v2536_v15  ;;  %v3429_v22 = vand.u32 4294901760, %v3428_v52 }
 0x3ac   : > { %5854 = vmatprep.subr.mxu0 %v7631_v10 }
 0x3ad   : > { %v2538_v56 = vsub.f32 %v2536_v15, %v2537_v50  ;;  %v3430_v32 = vsub.f32 %v3428_v52, %v3429_v22 }
 0x3ae   : > { %5847 = vmatmul.mubr.f32.vlgmr.msra.gmra.mxu0 %v2495_v20 }
 0x3af   : > { %5855 = vmatpush3.msra.mxu0 %v2537_v50  ;;  %v2539_v21 = vand.u32 4294901760, %v2538_v56  ;;  %5856 = vmatprep.mubr.msk.f32.mxu0 %vm6001_vm10, %v7631_v10  ;;  %v3431_v36 = vand.u32 4294901760, %v3430_v32  ;;  %v7097_v50 = vand.u32 4294901760, %v3833_v6 }
 0x3b0   : > { %2924 = vmatprep.subr.mxu0 %v7034_v28 }
 0x3b1   : > { %5840 = vmatpush3.msra.mxu1 %v2539_v21  ;;  %v7101_v61 = vsub.f32 %v3833_v6, %v7097_v50 }
 0x3b2   : > { %5842 = vmatmul.mubr.f32.vlgmr.msra.gmra.mxu1 %v2494_v17  ;;  %5849 = vmatprep.subr.mxu1 %v7631_v10 }
 0x3b3   : > { %5850 = vmatpush3.msra.mxu1 %v2459_v62  ;;  %5851 = vmatprep.mubr.msk.f32.mxu1 %vm6001_vm10, %v7631_v10 }
 0x3b4   : > { %5859 = vmatprep.subr.mxu1 %v7631_v10  ;;  %5857 = vmatmul.mubr.f32.vlgmr.msra.gmra.mxu0 %v2494_v17 }
 0x3b5   : > { %2959 = vmatprep.mubr.f32.mxu0 %v7631_v10  ;;  %2926 = vmatpush1.msra.mxu0 %v7036_v51 }
 0x3b6   : > { %5852 = vmatmul.mubr.f32.vlgmr.msra.gmra.mxu1 %v2496_v54  ;;  %3085 = vmatprep.subr.mxu0 %v7039_v27 }
 0x3b7   : > { %5860 = vmatpush3.msra.mxu1 %v2459_v62  ;;  %5861 = vmatprep.mubr.msk.f32.mxu1 %vm6001_vm10, %v7631_v10 }
 0x3b8   : > { %3006 = vmatprep.subr.mxu1 %v3005_v24 }
 0x3ba   : > { %5862 = vmatmul.mubr.f32.vlgmr.msra.gmra.mxu1 %v2494_v17  ;;  %v7090_v17 = vld [vmem:[%s7460_s8] sm:$0xf] }
 0x3bb   : > { %3045 = vmatprep.mubr.f32.mxu1 %v7631_v10  ;;  %3012 = vmatpush1.msra.mxu1 %v3011_v34 }
 0x3bc   : > { %3161 = vmatprep.subr.mxu1 %v7034_v28  ;;  %3828 = vperm.xlu0 %5919, %v7090_v17  }
 0x46a   : > { %v2500_v35 = vpop.f32.mrf.mxu0 }
 0x46b   : > { %v2501_v39 = vadd.f32 %v2500_v35, %v2420_v60 }
 0x46c   : > { %v5838_v3 = vpop.f32.mrf.mxu0 }
 0x46e   : > { %v2650_v13 = vpop.f32.mrf.mxu0 }
 0x470   : > { %v5848_v44 = vpop.f32.mrf.mxu0 }
 0x472   : > { %v2576_v55 = vpop.f32.mrf.mxu1 }
 0x473   : > { %v2577_v1 = vadd.f32 %v2576_v55, %v2501_v39 }
 0x474   : > { %v5843_v12 = vpop.f32.mrf.mxu1  ;;  %v2798_v38 = vpop.f32.mrf.mxu0 }
 0x475   : > { %v2651_v43 = vadd.f32 %v2650_v13, %v2577_v1 }
 0x476   : > { %v2724_v49 = vpop.f32.mrf.mxu1  ;;  %v5858_v58 = vpop.f32.mrf.mxu0 }
 0x477   : > { %v2725_v9 = vadd.f32 %v2724_v49, %v2651_v43 }
 0x478   : > { %v5853_v19 = vpop.f32.mrf.mxu1 }
 0x479   : > { %v2799_v25 = vadd.f32 %v2798_v38, %v2725_v9 }
 0x47a   : > { %v2870_v26 = vpop.f32.mrf.mxu1 }
 0x47b   : > { %v2871_v30 = vadd.f32 %v2870_v26, %v2799_v25 }
 0x47c   : > { %v5863_v31 = vpop.f32.mrf.mxu1 }
 0x47d   : > { %v2886_v23 = vsel %vm2884_vm13, %v2871_v30, 0 }
 0x47e   : > { %v2960_v33 = vand.u32 4294901760, %v2886_v23 }
 0x480   : > { %v2961_v14 = vsub.f32 %v2886_v23, %v2960_v33  ;;  %3047 = vmatmul.mubr.f32.vlgmr.msra.gmra.mxu1 %v2960_v33 }
 0x481   : > { %3163 = vmatpush1.msra.mxu1 %v7036_v51  ;;  %3196 = vmatprep.mubr.f32.mxu1 %v7631_v10 }
 0x482   : > { %v2962_v41 = vand.u32 4294901760, %v2961_v14  ;;  %3315 = vmatprep.subr.mxu1 %v7034_v28 }
 0x484   : > { %3200 = vmatmul.mubr.f32.vlgmr.msra.gmra.mxu1 %v2962_v41  ;;  %v2963_v45 = vsub.f32 %v2961_v14, %v2962_v41 }
 0x485   : > { %3317 = vmatpush1.msra.mxu1 %v7036_v51  ;;  %3350 = vmatprep.mubr.f32.mxu1 %v7631_v10 }
 0x486   : > { %v2964_v53 = vand.u32 4294901760, %v2963_v45  ;;  %3473 = vmatprep.subr.mxu1 %v3005_v24 }
 0x488   : > { %2965 = vmatmul.mubr.f32.vlgmr.msra.gmra.mxu0 %v2964_v53  ;;  %3352 = vmatmul.mubr.f32.vlgmr.msra.gmra.mxu1 %v2960_v33 }
 0x489   : > { %3088 = vmatpush1.msra.mxu0 %v7043_v29  ;;  %3121 = vmatprep.mubr.f32.mxu0 %v7631_v10 }
 0x48a   : > { %3479 = vmatpush1.msra.mxu1 %v3011_v34  ;;  %3512 = vmatprep.mubr.f32.mxu1 %v7631_v10  ;;  %v7109_v34 = vld [vmem:[%s350_s14 + $0x8] sm:$0xff] }
 0x48b   : > { %3239 = vmatprep.subr.mxu0 %v7047_v18  ;;  %3628 = vmatprep.subr.mxu1 %v7034_v28 }
 0x48c   : > { %3124 = vmatmul.mubr.f32.vlgmr.msra.gmra.mxu0 %v2961_v14  ;;  %3514 = vmatmul.mubr.f32.vlgmr.msra.gmra.mxu1 %v3427_v40 }
 0x48d   : > { %3243 = vmatpush1.msra.mxu0 %v7051_v5  ;;  %3276 = vmatprep.mubr.f32.mxu0 %v7631_v10 }
 0x48e   : > { %3630 = vmatpush1.msra.mxu1 %v7036_v51  ;;  %3663 = vmatprep.mubr.f32.mxu1 %v7631_v10 }
 0x48f   : > { %3391 = vmatprep.subr.mxu0 %v7034_v28  ;;  %3782 = vmatprep.subr.mxu1 %v7034_v28 }
 0x490   : > { %3278 = vmatmul.mubr.f32.vlgmr.msra.gmra.mxu0 %v2960_v33  ;;  %3667 = vmatmul.mubr.f32.vlgmr.msra.gmra.mxu1 %v3429_v22 }
 0x491   : > { %3393 = vmatpush1.msra.mxu0 %v7036_v51  ;;  %3426 = vmatprep.mubr.f32.mxu0 %v7631_v10 }
 0x492   : > { %3784 = vmatpush1.msra.mxu1 %v7036_v51  ;;  %3817 = vmatprep.mubr.f32.mxu1 %v7631_v10 }
 0x493   : > { %3552 = vmatprep.subr.mxu0 %v7039_v27 }
 0x494   : > { %3432 = vmatmul.mubr.f32.vlgmr.msra.gmra.mxu0 %v3431_v36  ;;  %3819 = vmatmul.mubr.f32.vlgmr.msra.gmra.mxu1 %v3427_v40 }
 0x495   : > { %3555 = vmatpush1.msra.mxu0 %v7043_v29  ;;  %3588 = vmatprep.mubr.f32.mxu0 %v7631_v10  ;;  %v3904_v29 = vand.u32 4294901760, %v7101_v61 }
 0x496   : > { %3706 = vmatprep.subr.mxu0 %v7047_v18  ;;  %3987 = vmatprep.mubr.f32.mxu1 %v7631_v10 }
 0x497   : > { %v3905_v39 = vsub.f32 %v7101_v61, %v3904_v29 }
 0x498   : > { %3591 = vmatmul.mubr.f32.vlgmr.msra.gmra.mxu0 %v3428_v52 }
 0x499   : > { %3710 = vmatpush1.msra.mxu0 %v7051_v5  ;;  %3743 = vmatprep.mubr.f32.mxu0 %v7631_v10  ;;  %v7107_v5 = vld [vmem:[%s350_s14] sm:$0xff]  ;;  %v3906_v19 = vand.u32 4294901760, %v3905_v39 }
 0x49c   : > { %3745 = vmatmul.mubr.f32.vlgmr.msra.gmra.mxu0 %v3427_v40 }
 0x49d   : > { %3901 = vmatprep.mubr.f32.mxu0 %v7631_v10 }
 0x540   : > { %v3048_v20 = vpop.f32.mrf.mxu1 }
 0x542   : > { %v3050_v54 = vpop.f32.mrf.mxu1 }
 0x544   : > { %v3201_v63 = vpop.f32.mrf.mxu1 }
 0x546   : > { %v3203_v47 = vpop.f32.mrf.mxu1 }
 0x548   : > { %v2966_v62 = vpop.f32.mrf.mxu0  ;;  %v3353_v15 = vpop.f32.mrf.mxu1 }
 0x549   : > { %v3049_v11 = vadd.f32 %v3048_v20, %v2966_v62 }
 0x54a   : > { %v2968_v56 = vpop.f32.mrf.mxu0  ;;  %v3355_v21 = vpop.f32.mrf.mxu1 }
 0x54b   : > { %v3051_v7 = vadd.f32 %v3050_v54, %v2968_v56  ;;  %v3829_v54 = vpop.permute.xlu0 %3828 }
 0x54c   : > { %v3125_v57 = vpop.f32.mrf.mxu0  ;;  %v3515_v16 = vpop.f32.mrf.mxu1 }
 0x54d   : > { %v3126_v48 = vadd.f32 %v3125_v57, %v3049_v11 }
 0x54e   : > { %v3127_v37 = vpop.f32.mrf.mxu0  ;;  %v3517_v18 = vpop.f32.mrf.mxu1 }
 0x54f   : > { %v3128_v42 = vadd.f32 %v3127_v37, %v3051_v7  ;;  %v3202_v46 = vadd.f32 %v3201_v63, %v3126_v48 }
 0x550   : > { %v3279_v28 = vpop.f32.mrf.mxu0  ;;  %v3668_v44 = vpop.f32.mrf.mxu1 }
 0x551   : > { %v3280_v51 = vadd.f32 %v3279_v28, %v3202_v46  ;;  %v3204_v27 = vadd.f32 %v3203_v47, %v3128_v42 }
 0x552   : > { %v3281_v8 = vpop.f32.mrf.mxu0  ;;  %v3670_v25 = vpop.f32.mrf.mxu1 }
 0x553   : > { %v3354_v0 = vadd.f32 %v3353_v15, %v3280_v51  ;;  %v3282_v24 = vadd.f32 %v3281_v8, %v3204_v27 }
 0x554   : > { %v3433_v35 = vpop.f32.mrf.mxu0  ;;  %v3820_v45 = vpop.f32.mrf.mxu1 }
 0x555   : > { %v3825_v60 = vmul.f32 %v3354_v0, %v7107_v5  ;;  %v3356_v3 = vadd.f32 %v3355_v21, %v3282_v24  ;;  %v3516_v13 = vadd.f32 %v3515_v16, %v3433_v35  ;;  %v6004_v35 = vmov 4  }
 0x556   : > { %v3435_v55 = vpop.f32.mrf.mxu0  ;;  %v7130_v6 = vpop.f32.mrf.mxu1  ;;  %5920 = vset.pattern.permute.xlu0 %v6004_v35 }
 0x557   : > { %v3867_v1 = vand.u32 4294901760, %v3825_v60  ;;  %v3826_v12 = vmul.f32 %v3356_v3, %v7109_v34  ;;  %v3518_v38 = vadd.f32 %v3517_v18, %v3435_v55  ;;  %v4310_v55 = vld [vmem:[%s7455_s3 + $0x40] sm:$0xf] }
 0x558   : > { %v3592_v43 = vpop.f32.mrf.mxu0 }
 0x559   : > { %v3950_v49 = vsub.f32 %v3825_v60, %v3867_v1  ;;  %v3865_v58 = vand.u32 4294901760, %v3826_v12  ;;  %v3593_v9 = vadd.f32 %v3592_v43, %v3516_v13  ;;  %v6005_v60 = vmov 5  }
 0x55a   : > { %v3594_v26 = vpop.f32.mrf.mxu0  ;;  %5921 = vset.pattern.permute.xlu1 %v6005_v60 }
 0x55b   : > { %v3595_v30 = vadd.f32 %v3594_v26, %v3518_v38  ;;  %3866 = vmatprep.subr.mxu0 %v3865_v58  ;;  %v3669_v31 = vadd.f32 %v3668_v44, %v3593_v9  ;;  %v3944_v23 = vsub.f32 %v3826_v12, %v3865_v58  ;;  %v3951_v33 = vand.u32 4294901760, %v3950_v49  ;;  %v355_v12 = vld [vmem:[%s7458_s6 + $0x4] sm:$0xf] }
 0x55c   : > { %v3746_v4 = vpop.f32.mrf.mxu0  ;;  %3868 = vmatpush1.msra.mxu0 %v3867_v1 }
 0x55d   : > { %v3747_v14 = vadd.f32 %v3746_v4, %v3669_v31  ;;  %3907 = vmatmul.mubr.f32.vlgmr.msra.gmra.mxu0 %v3906_v19  ;;  %4027 = vmatprep.subr.mxu0 %v3944_v23  ;;  %v7114_v40 = vadd.f32 %v3670_v25, %v3595_v30  ;;  %v3945_v41 = vand.u32 4294901760, %v3944_v23  ;;  %v3952_v52 = vsub.f32 %v3950_v49, %v3951_v33 }
 0x55e   : > { %4030 = vmatpush1.msra.mxu0 %v3950_v49  ;;  %4063 = vmatprep.mubr.f32.mxu0 %v7631_v10  ;;  %v7128_v59 = vpop.f32.mrf.mxu0  ;;  %v4407_v25 = vsel %vm481_vm2, %v355_v12, 0 }
 0x55f   : > { %v7117_v53 = vadd.f32 %v3820_v45, %v3747_v14  ;;  %4181 = vmatprep.subr.mxu0 %v3945_v41  ;;  %v3946_v22 = vsub.f32 %v3944_v23, %v3945_v41  ;;  %v3953_v36 = vand.u32 4294901760, %v3952_v52 }
 0x561   : > { %4066 = vmatmul.mubr.f32.vlgmr.msra.gmra.mxu0 %v7101_v61  ;;  %v3947_v32 = vand.u32 4294901760, %v3946_v22  ;;  %v4306_v22 = vld [vmem:[%s7455_s3 + $0x20] sm:$0xff] }
 0x562   : > { %4185 = vmatpush1.msra.mxu0 %v3951_v33  ;;  %4218 = vmatprep.mubr.f32.mxu0 %v7631_v10 }
 0x563   : > { %3948 = vmatprep.subr.mxu1 %v3947_v32  ;;  %v4307_v32 = vld [vmem:[%s7455_s3 + $0x28] sm:$0xff] }
 0x564   : > { %3954 = vmatpush1.msra.mxu1 %v3953_v36 }
 0x565   : > { %3989 = vmatmul.mubr.f32.vlgmr.msra.gmra.mxu1 %v7097_v50  ;;  %4103 = vmatprep.subr.mxu1 %v3865_v58 }
 0x566   : > { %4105 = vmatpush1.msra.mxu1 %v3867_v1  ;;  %4138 = vmatprep.mubr.f32.mxu1 %v7631_v10 }
 0x567   : > { %4257 = vmatprep.subr.mxu1 %v3865_v58  ;;  %4220 = vmatmul.mubr.f32.vlgmr.msra.gmra.mxu0 %v7097_v50 }
 0x568   : > { %4489 = vmatprep.mubr.f32.mxu0 %v7631_v10 }
 0x569   : > { %4142 = vmatmul.mubr.f32.vlgmr.msra.gmra.mxu1 %v3904_v29 }
 0x56a   : > { %4259 = vmatpush1.msra.mxu1 %v3867_v1  ;;  %4292 = vmatprep.mubr.f32.mxu1 %v7631_v10  ;;  %v4311_v1 = vld [vmem:[%s7455_s3 + $0x48] sm:$0xf] }
 0x56d   : > { %4294 = vmatmul.mubr.f32.vlgmr.msra.gmra.mxu1 %v7097_v50 }
 0x56e   : > { %4615 = vmatprep.mubr.f32.mxu1 %v7631_v10 }
 0x61d   : > { %v3908_v20 = vpop.f32.mrf.mxu0 }
 0x61e   : > { %v3909_v47 = vadd.f32 %v3908_v20, %v3829_v54 }
 0x61f   : > { %v3910_v2 = vpop.f32.mrf.mxu0 }
 0x620   : > { %v3911_v56 = vadd.f32 %v3910_v2, %v3829_v54  ;;  %v7184_v54 = vand.u32 4294901760, %v4407_v25 }
 0x621   : > { %v4067_v63 = vpop.f32.mrf.mxu0 }
 0x623   : > { %v4069_v15 = vpop.f32.mrf.mxu0 }
 0x625   : > { %v3990_v62 = vpop.f32.mrf.mxu1 }
 0x626   : > { %v3991_v21 = vadd.f32 %v3990_v62, %v3909_v47 }
 0x627   : > { %v3992_v11 = vpop.f32.mrf.mxu1  ;;  %v4221_v50 = vpop.f32.mrf.mxu0 }
 0x628   : > { %v3993_v57 = vadd.f32 %v3992_v11, %v3911_v56  ;;  %v4068_v7 = vadd.f32 %v4067_v63, %v3991_v21  ;;  %v4308_v21 = vld [vmem:[%s7455_s3 + $0x30] sm:$0xff]  ;;  %v4309_v11 = vld [vmem:[%s7455_s3 + $0x38] sm:$0xff] }
 0x629   : > { %v4143_v48 = vpop.f32.mrf.mxu1  ;;  %v4223_v28 = vpop.f32.mrf.mxu0 }
 0x62a   : > { %v4070_v61 = vadd.f32 %v4069_v15, %v3993_v57  ;;  %v4144_v16 = vadd.f32 %v4143_v48, %v4068_v7 }
 0x62b   : > { %v4145_v37 = vpop.f32.mrf.mxu1 }
 0x62c   : > { %v4146_v42 = vadd.f32 %v4145_v37, %v4070_v61  ;;  %v4222_v46 = vadd.f32 %v4221_v50, %v4144_v16 }
 0x62d   : > { %v4295_v51 = vpop.f32.mrf.mxu1 }
 0x62e   : > { %v4224_v27 = vadd.f32 %v4223_v28, %v4146_v42  ;;  %v4296_v29 = vadd.f32 %v4295_v51, %v4222_v46 }
 0x62f   : > { %v4297_v18 = vpop.f32.mrf.mxu1 }
 0x630   : > { %v4300_v8 = vmax.f32 %v4296_v29, 0.0  ;;  %v4298_v0 = vadd.f32 %v4297_v18, %v4224_v27 }
 0x632   : > { %4354 = vrot.lane.b32.xlu0 %v4300_v8, %s5991_s26  ;;  %4348 = vrot.lane.b32.xlu1 %v4300_v8, %s5992_s27  ;;  %v4301_v24 = vmax.f32 %v4298_v0, 0.0 }
 0x636   : > { %4336 = vrot.lane.b32.xlu0 %v4300_v8, %s5993_s28  ;;  %4350 = vrot.lane.b32.xlu1 %v4301_v24, %s5992_s27 }
 0x63a   : > { %4342 = vrot.lane.b32.xlu0 %v4300_v8, %s5994_s29  ;;  %4356 = vrot.lane.b32.xlu1 %v4301_v24, %s5991_s26  ;;  %s338_s26 = sand.u32 1, %s5981_s10  }
 0x63b   : > { %s5557_s27 = sshll.u32 %s338_s26, 3 }
 0x63e   : > { %4330 = vrot.lane.b32.xlu0 %v4300_v8, %s7638_s21  ;;  %4338 = vrot.lane.b32.xlu1 %v4301_v24, %s5993_s28  ;;  %s5569_s28 = sshll.u32 %s6078_s13, 7 }
 0x63f   : > { %s5480_s14 = scalar_lea.hbm %s7461_s9, %s5569_s28 }
 0x642   : > { %4318 = vrot.lane.b32.xlu0 %v4300_v8, %s7639_s17  ;;  %4344 = vrot.lane.b32.xlu1 %v4301_v24, %s5994_s29  ;;  %s340_s29 = scalar_lea.vmem [#allocation2], %s5557_s27 }
 0x643   : > { %s5482_s23 = sshll.u32 %s340_s29, 4  ;;  %s5483_s23 = int_to_ptr.vmem [resolvable:$true] %s5482_s23 }
 0x646   : > { %4324 = vrot.lane.b32.xlu0 %v4300_v8, %s7640_s22  ;;  %4332 = vrot.lane.b32.xlu1 %v4301_v24, %s7638_s21  ;;  %s5468_s21 = scalar_lea.sflag [#allocation3], %s338_s26 }
 0x64a   : > { %4312 = vrot.lane.b32.xlu0 %v4300_v8, %s7641_s25  ;;  %4320 = vrot.lane.b32.xlu1 %v4301_v24, %s7639_s17  ;;  %s5929_s17 = scalar_lea.vmem %s5483_s23, 128 }
 0x64b   : > { %p5930_p11 = scmp.ne.s32.totalorder %s5483_s23, %s5929_s17 }
 0x64d   : > { %p5931_p12 = pnand %p5930_p11, %p6095_p5 }
 0x64e   : > { %4326 = vrot.lane.b32.xlu1 %v4301_v24, %s7640_s22  ;;  %4403 = vperm.xlu0 %5920, %v7090_v17   ;;  %s6006_s22 = smov [#allocation2]  }
 0x64f   : > { %p5932_p13 = pneg %p5931_p12  ;;  %s5933_s13 = sshll.u32 %s6006_s22, 4  ;;  %s5934_s13 = int_to_ptr.vmem [resolvable:$false] %s5933_s13 }
 0x650   : > { %p5936_p0 = scmp.lt.s32.totalorder %s5483_s23, %s5934_s13 }
 0x652   : > { %4314 = vrot.lane.b32.xlu1 %v4301_v24, %s7641_s25  ;;  %5922 = vset.pattern.permute.xlu0 %v6005_v60  ;;  %s5935_s25 = scalar_lea.vmem %s5934_s13, 256 }
 0x653   : > { %p5937_p1 = scmp.lt.s32.totalorder %s5935_s25, %s5929_s17 }
 0x655   : > { %p5938_p2 = por %p5937_p1, %p5936_p0 }
 0x656   : > { %4987 = vperm.xlu1 %5921, %v7090_v17  }
 0x657   : > { %p5939_p3 = pnand %p5938_p2, %p5932_p13 }
 0x6a4   : > { %v4355_v3 = vpop.permute.xlu0 %4354  ;;  %v4349_v13 = vpop.permute.xlu1 %4348 }
 0x6a8   : > { %v4337_v39 = vpop.permute.xlu0 %4336  ;;  %v4351_v44 = vpop.permute.xlu1 %4350 }
 0x6a9   : > { %v4352_v26 = vsel %vm423_vm4, %v4349_v13, %v4351_v44  ;;  %v4353_v30 = vsel %vm423_vm4, %v4351_v44, %v4349_v13 }
 0x6aa   : > { %v4380_v47 = vrot.slane %v4352_v26, 4  ;;  %v4381_v62 = vrot.slane %v4353_v30, 4 }
 0x6ac   : > { %v4343_v38 = vpop.permute.xlu0 %4342  ;;  %v4357_v43 = vpop.permute.xlu1 %4356 }
 0x6ad   : > { %v4358_v49 = vsel %vm430_vm0, %v4355_v3, %v4357_v43  ;;  %v4359_v58 = vsel %vm430_vm0, %v4357_v43, %v4355_v3 }
 0x6ae   : > { %v4400_v9 = vmul.f32 %v4358_v49, %v4310_v55  ;;  %v4401_v19 = vmul.f32 %v4359_v58, %v4311_v1 }
 0x6b0   : > { %v4410_v31 = vsel %vm457_vm1, %v4400_v9, 0  ;;  %v4413_v23 = vsel %vm457_vm1, %v4401_v19, 0  ;;  %v4339_v33 = vpop.permute.xlu1 %4338  ;;  %v4331_v52 = vpop.permute.xlu0 %4330 }
 0x6b1   : > { %v7170_v4 = vand.u32 4294901760, %v4413_v23  ;;  %v7172_v14 = vand.u32 4294901760, %v4410_v31  ;;  %v4340_v41 = vsel %vm409_vm3, %v4337_v39, %v4339_v33  ;;  %v4341_v45 = vsel %vm409_vm3, %v4339_v33, %v4337_v39 }
 0x6b2   : > { %v4374_v36 = vrot.slane %v4340_v41, 4  ;;  %v4375_v20 = vrot.slane %v4341_v45, 4  ;;  %v7225_v39 = vsub.f32 %v4407_v25, %v7184_v54 }
 0x6b3   : > { %v7187_v2 = vsub.f32 %v4413_v23, %v7170_v4  ;;  %v7190_v63 = vsub.f32 %v4410_v31, %v7172_v14  ;;  %4438 = vmatprep.subr.mxu0 %v7170_v4 }
 0x6b4   : > { %v4388_v15 = vsel %vm457_vm1, %v4300_v8, %v4374_v36  ;;  %v4389_v56 = vsel %vm457_vm1, %v4301_v24, %v4375_v20  ;;  %4440 = vmatpush1.msra.mxu0 %v7172_v14  ;;  %v4345_v57 = vpop.permute.xlu1 %4344  ;;  %v4319_v18 = vpop.permute.xlu0 %4318  ;;  %v4492_v30 = vand.u32 4294901760, %v7225_v39 }
 0x6b5   : > { %v4396_v7 = vmul.f32 %v4388_v15, %v4306_v22  ;;  %v4397_v48 = vmul.f32 %v4389_v56, %v4307_v32  ;;  %v4346_v50 = vsel %vm416_vm5, %v4343_v38, %v4345_v57  ;;  %v4347_v61 = vsel %vm416_vm5, %v4345_v57, %v4343_v38  ;;  %v4304_v22 = vld [vmem:[%s7455_s3 + $0x10] sm:$0xff]  ;;  %v4305_v32 = vld [vmem:[%s7455_s3 + $0x18] sm:$0xff] }
 0x6b6   : > { %v4390_v16 = vsel %vm457_vm1, %v4346_v50, %v4380_v47  ;;  %v4391_v37 = vsel %vm457_vm1, %v4347_v61, %v4381_v62  ;;  %v4525_v42 = vand.u32 4294901760, %v7187_v2  ;;  %v4531_v46 = vand.u32 4294901760, %v7190_v63 }
 0x6b7   : > { %v4398_v28 = vmul.f32 %v4390_v16, %v4308_v21  ;;  %v4399_v51 = vmul.f32 %v4391_v37, %v4309_v11  ;;  %v7210_v27 = vand.u32 4294901760, %v4397_v48  ;;  %v7212_v29 = vand.u32 4294901760, %v4396_v7 }
 0x6b8   : > { %v4333_v8 = vpop.permute.xlu1 %4332  ;;  %v4526_v0 = vsub.f32 %v7187_v2, %v4525_v42  ;;  %v4532_v24 = vsub.f32 %v7190_v63, %v4531_v46  ;;  %v4325_v19 = vpop.permute.xlu0 %4324 }
 0x6b9   : > { %v7220_v35 = vand.u32 4294901760, %v4399_v51  ;;  %v7222_v60 = vand.u32 4294901760, %v4398_v28  ;;  %v7235_v1 = vsub.f32 %v4397_v48, %v7210_v27  ;;  %v7238_v12 = vsub.f32 %v4396_v7, %v7212_v29 }
 0x6ba   : > { %v4527_v3 = vand.u32 4294901760, %v4526_v0  ;;  %v4533_v13 = vand.u32 4294901760, %v4532_v24  ;;  %v4334_v38 = vsel %vm402_vm6, %v4331_v52, %v4333_v8  ;;  %v4335_v43 = vsel %vm402_vm6, %v4333_v8, %v4331_v52 }
 0x6bb   : > { %v7228_v44 = vsub.f32 %v4399_v51, %v7220_v35  ;;  %v7231_v55 = vsub.f32 %v4398_v28, %v7222_v60  ;;  %4442 = vmatprep.subr.mxu0 %v7220_v35  ;;  %v4549_v25 = vand.u32 4294901760, %v7235_v1  ;;  %v4555_v26 = vand.u32 4294901760, %v7238_v12  ;;  %v4302_v28 = vld [vmem:[%s7455_s3] sm:$0xff]  ;;  %v4303_v51 = vld [vmem:[%s7455_s3 + $0x8] sm:$0xff] }
 0x6bc   : > { %4528 = vmatprep.subr.mxu1 %v4527_v3  ;;  %4444 = vmatpush1.msra.mxu0 %v7222_v60  ;;  %v4321_v49 = vpop.permute.xlu1 %4320  ;;  %v4368_v31 = vrot.slane %v4335_v43, 4  ;;  %v4369_v23 = vrot.slane %v4334_v38, 4  ;;  %v4313_v61 = vpop.permute.xlu0 %4312  ;;  %v4493_v0 = vsub.f32 %v7225_v39, %v4492_v30 }
 0x6bd   : > { %4534 = vmatpush1.msra.mxu1 %v4533_v13  ;;  %4446 = vmatprep.subr.mxu0 %v7210_v27  ;;  %v4537_v58 = vand.u32 4294901760, %v7228_v44  ;;  %v4543_v9 = vand.u32 4294901760, %v7231_v55  ;;  %v4322_v45 = vsel %vm388_vm7, %v4319_v18, %v4321_v49  ;;  %v4323_v52 = vsel %vm388_vm7, %v4321_v49, %v4319_v18 }
 0x6be   : > { %4448 = vmatpush1.msra.mxu0 %v7212_v29  ;;  %v4550_v20 = vsub.f32 %v7235_v1, %v4549_v25  ;;  %v4556_v47 = vsub.f32 %v7238_v12, %v4555_v26  ;;  %v4362_v16 = vrot.slane %v4323_v52, 4  ;;  %v4363_v37 = vrot.slane %v4322_v45, 4 }
 0x6bf   : > { %v4538_v33 = vsub.f32 %v7228_v44, %v4537_v58  ;;  %v4544_v41 = vsub.f32 %v7231_v55, %v4543_v9  ;;  %v4494_v17 = vand.u32 4294901760, %v4493_v0 }
 0x6c0   : > { %v4327_v36 = vpop.permute.xlu1 %4326  ;;  %v4551_v50 = vand.u32 4294901760, %v4550_v20  ;;  %v4557_v8 = vand.u32 4294901760, %v4556_v47 }
 0x6c1   : > { %v4328_v62 = vsel %vm395_vm8, %v4325_v19, %v4327_v36  ;;  %v4329_v15 = vsel %vm395_vm8, %v4327_v36, %v4325_v19  ;;  %v4539_v56 = vand.u32 4294901760, %v4538_v33  ;;  %v4545_v21 = vand.u32 4294901760, %v4544_v41 }
 0x6c2   : > { %v4386_v11 = vsel %vm457_vm1, %v4329_v15, %v4368_v31  ;;  %v4387_v57 = vsel %vm457_vm1, %v4328_v62, %v4369_v23 }
 0x6c3   : > { %v4394_v7 = vmul.f32 %v4386_v11, %v4304_v22  ;;  %v4395_v48 = vmul.f32 %v4387_v57, %v4305_v32  ;;  %4540 = vmatprep.subr.mxu1 %v4539_v56  ;;  %v359_v11 = vld [vmem:[%s7459_s7 + $0x10] sm:$0xf] }
 0x6c4   : > { %4546 = vmatpush1.msra.mxu1 %v4545_v21  ;;  %v4315_v18 = vpop.permute.xlu1 %4314 }
 0x6c5   : > { %v7289_v24 = vand.u32 4294901760, %v4395_v48  ;;  %v7291_v3 = vand.u32 4294901760, %v4394_v7  ;;  %v4316_v13 = vsel %vm381_vm9, %v4313_v61, %v4315_v18  ;;  %v4317_v38 = vsel %vm381_vm9, %v4315_v18, %v4313_v61  ;;  %4552 = vmatprep.subr.mxu1 %v4551_v50 }
 0x6c6   : > { %v4384_v43 = vsel %vm457_vm1, %v4317_v38, %v4362_v16  ;;  %v4385_v49 = vsel %vm457_vm1, %v4316_v13, %v4363_v37  ;;  %4558 = vmatpush1.msra.mxu1 %v4557_v8  ;;  %v4991_v61 = vsel %vm3831_vm14, %v359_v11, 0  ;;  %v7352_v37 = vand.u32 4294901760, %v7109_v34 }
 0x6c7   : > { %v7300_v19 = vsub.f32 %v4395_v48, %v7289_v24  ;;  %v7303_v31 = vsub.f32 %v4394_v7, %v7291_v3  ;;  %v4392_v23 = vmul.f32 %v4384_v43, %v4302_v28  ;;  %v4393_v33 = vmul.f32 %v4385_v49, %v4303_v51  ;;  %4450 = vmatprep.subr.mxu0 %v7289_v24 }
 0x6c8   : > { %4452 = vmatpush1.msra.mxu0 %v7291_v3  ;;  %v7340_v16 = vand.u32 4294901760, %v4991_v61  ;;  %v5025_v51 = vand.u32 4294901760, %v7107_v5  ;;  %v3749_v11 = vadd.f32 %v7128_v59, %v7114_v40 }
 0x6c9   : > { %v7307_v41 = vand.u32 4294901760, %v4393_v33  ;;  %v7309_v45 = vand.u32 4294901760, %v4392_v23  ;;  %v4561_v52 = vand.u32 4294901760, %v7300_v19  ;;  %v4567_v22 = vand.u32 4294901760, %v7303_v31 }
 0x6ca   : > { %v7355_v28 = vsub.f32 %v4991_v61, %v7340_v16 }
 0x6cb   : > { %v7314_v32 = vsub.f32 %v4393_v33, %v7307_v41  ;;  %v7317_v36 = vsub.f32 %v4392_v23, %v7309_v45  ;;  %4454 = vmatprep.subr.mxu0 %v7307_v41  ;;  %v4562_v20 = vsub.f32 %v7300_v19, %v4561_v52  ;;  %v4568_v47 = vsub.f32 %v7303_v31, %v4567_v22 }
 0x6cc   : > { %4456 = vmatpush1.msra.mxu0 %v7309_v45 }
 0x6cd   : > { %4647 = vmatprep.subr.mxu0 %v7187_v2  ;;  %4495 = vmatmul.mubr.f32.vlgmr.msra.gmra.mxu0 %v4494_v17  ;;  %v4563_v62 = vand.u32 4294901760, %v4562_v20  ;;  %v4569_v15 = vand.u32 4294901760, %v4568_v47  ;;  %v4573_v56 = vand.u32 4294901760, %v7314_v32  ;;  %v4579_v21 = vand.u32 4294901760, %v7317_v36 }
 0x6ce   : > { %4650 = vmatpush1.msra.mxu0 %v7190_v63  ;;  %4707 = vmatprep.mubr.f32.mxu0 %v7631_v10  ;;  %v5062_v2 = vand.u32 4294901760, %v7355_v28  ;;  %v5102_v63 = vsub.f32 %v7109_v34, %v7352_v37 }
 0x6cf   : > { %4564 = vmatprep.subr.mxu1 %v4563_v62  ;;  %4653 = vmatprep.subr.mxu0 %v7228_v44  ;;  %v4574_v57 = vsub.f32 %v7314_v32, %v4573_v56  ;;  %v4580_v7 = vsub.f32 %v7317_v36, %v4579_v21 }
 0x6d0   : > { %4570 = vmatpush1.msra.mxu1 %v4569_v15  ;;  %4656 = vmatpush1.msra.mxu0 %v7231_v55  ;;  %v5063_v34 = vsub.f32 %v7355_v28, %v5062_v2 }
 0x6d1   : > { %4659 = vmatprep.subr.mxu0 %v7235_v1  ;;  %v4575_v48 = vand.u32 4294901760, %v4574_v57  ;;  %v4581_v50 = vand.u32 4294901760, %v4580_v7 }
 0x6d2   : > { %4662 = vmatpush1.msra.mxu0 %v7238_v12 }
 0x6d3   : > { %4576 = vmatprep.subr.mxu1 %v4575_v48  ;;  %4665 = vmatprep.subr.mxu0 %v7300_v19 }
 0x6d4   : > { %4582 = vmatpush1.msra.mxu1 %v4581_v50  ;;  %4668 = vmatpush1.msra.mxu0 %v7303_v31 }
 0x6d5   : > { %4671 = vmatprep.subr.mxu0 %v7314_v32  ;;  %4739 = vmatprep.subr.mxu1 %v7170_v4 }
 0x6d6   : > { %4617 = vmatmul.mubr.f32.vlgmr.msra.gmra.mxu1 %v7184_v54  ;;  %4674 = vmatpush1.msra.mxu0 %v7317_v36 }
 0x6d7   : > { %4741 = vmatpush1.msra.mxu1 %v7172_v14  ;;  %4825 = vmatprep.subr.mxu0 %v4525_v42  ;;  %v5108_v42 = vsub.f32 %v7107_v5, %v5025_v51  ;;  %v5064_v5 = vand.u32 4294901760, %v5063_v34 }
 0x6d8   : > { %4743 = vmatprep.subr.mxu1 %v7220_v35  ;;  %4710 = vmatmul.mubr.f32.vlgmr.msra.gmra.mxu0 %v7225_v39 }
 0x6d9   : > { %4745 = vmatpush1.msra.mxu1 %v7222_v60  ;;  %4829 = vmatpush1.msra.mxu0 %v4531_v46  ;;  %v5103_v46 = vand.u32 4294901760, %v5102_v63  ;;  %v5109_v44 = vand.u32 4294901760, %v5108_v42 }
 0x6da   : > { %4747 = vmatprep.subr.mxu1 %v7210_v27  ;;  %4833 = vmatprep.subr.mxu0 %v4537_v58 }
 0x6db   : > { %4749 = vmatpush1.msra.mxu1 %v7212_v29  ;;  %4837 = vmatpush1.msra.mxu0 %v4543_v9  ;;  %v5104_v39 = vsub.f32 %v5102_v63, %v5103_v46  ;;  %v5110_v55 = vsub.f32 %v5108_v42, %v5109_v44 }
 0x6dc   : > { %4751 = vmatprep.subr.mxu1 %v7289_v24  ;;  %4841 = vmatprep.subr.mxu0 %v4549_v25 }
 0x6dd   : > { %4753 = vmatpush1.msra.mxu1 %v7291_v3  ;;  %4845 = vmatpush1.msra.mxu0 %v4555_v26 }
 0x6de   : > { %4755 = vmatprep.subr.mxu1 %v7307_v41  ;;  %4849 = vmatprep.subr.mxu0 %v4561_v52 }
 0x6df   : > { %4757 = vmatpush1.msra.mxu1 %v7309_v45  ;;  %4790 = vmatprep.mubr.f32.mxu1 %v7631_v10 }
 0x6e0   : > { %4853 = vmatpush1.msra.mxu0 %v4567_v22  ;;  %4794 = vmatmul.mubr.f32.vlgmr.msra.gmra.mxu1 %v4492_v30 }
 0x6e1   : > { %4857 = vmatprep.subr.mxu0 %v4573_v56  ;;  %4925 = vmatprep.subr.mxu1 %v7170_v4  ;;  %v5105_v4 = vand.u32 4294901760, %v5104_v39 }
 0x6e2   : > { %4861 = vmatpush1.msra.mxu0 %v4579_v21  ;;  %4894 = vmatprep.mubr.f32.mxu0 %v7631_v10 }
 0x6e3   : > { %4927 = vmatpush1.msra.mxu1 %v7172_v14  ;;  %4896 = vmatmul.mubr.f32.vlgmr.msra.gmra.mxu0 %v7184_v54  ;;  %v5111_v14 = vand.u32 4294901760, %v5110_v55 }
 0x6e4   : > { %4929 = vmatprep.subr.mxu1 %v7220_v35  ;;  %4976 = vmatprep.mubr.f32.mxu1 %v7631_v10  ;;  %v4404_v35 = vpop.permute.xlu0 %4403 }
 0x6e5   : > { %4931 = vmatpush1.msra.mxu1 %v7222_v60  ;;  %5024 = vmatprep.subr.mxu0 %v7352_v37 }
 0x6e6   : > { %4933 = vmatprep.subr.mxu1 %v7210_v27  ;;  %5026 = vmatpush1.msra.mxu0 %v5025_v51 }
 0x6e7   : > { %4935 = vmatpush1.msra.mxu1 %v7212_v29  ;;  %5059 = vmatprep.mubr.f32.mxu0 %v7631_v10 }
 0x6e8   : > { %4937 = vmatprep.subr.mxu1 %v7289_v24  ;;  %5065 = vmatmul.mubr.f32.vlgmr.msra.gmra.mxu0 %v5064_v5  ;;  %v4988_v24 = vpop.permute.xlu1 %4987 }
 0x6e9   : > { %4939 = vmatpush1.msra.mxu1 %v7291_v3  ;;  %5185 = vmatprep.subr.mxu0 %v5102_v63 }
 0x6ea   : > { %4941 = vmatprep.subr.mxu1 %v7307_v41  ;;  %5188 = vmatpush1.msra.mxu0 %v5108_v42 }
 0x6eb   : > { %4943 = vmatpush1.msra.mxu1 %v7309_v45  ;;  %5221 = vmatprep.mubr.f32.mxu0 %v7631_v10 }
 0x6ec   : > { %4978 = vmatmul.mubr.f32.vlgmr.msra.gmra.mxu1 %v7184_v54  ;;  %5106 = vmatprep.subr.mxu1 %v5105_v4 }
 0x6ed   : > { %5112 = vmatpush1.msra.mxu1 %v5111_v14  ;;  %5145 = vmatprep.mubr.f32.mxu1 %v7631_v10 }
 0x6ee   : > { %5224 = vmatmul.mubr.f32.vlgmr.msra.gmra.mxu0 %v7355_v28  ;;  %5261 = vmatprep.subr.mxu1 %v7352_v37 }
 0x6ef   : > { %5339 = vmatprep.subr.mxu0 %v5103_v46  ;;  %5376 = vmatprep.mubr.f32.mxu0 %v7631_v10 }
 0x6f0   : > { %5147 = vmatmul.mubr.f32.vlgmr.msra.gmra.mxu1 %v7340_v16  ;;  %5343 = vmatpush1.msra.mxu0 %v5109_v44 }
 0x6f1   : > { %5263 = vmatpush1.msra.mxu1 %v5025_v51  ;;  %5296 = vmatprep.mubr.f32.mxu1 %v7631_v10 }
 0x6f2   : > { %5378 = vmatmul.mubr.f32.vlgmr.msra.gmra.mxu0 %v7340_v16  ;;  %5415 = vmatprep.subr.mxu1 %v7352_v37 }
 0x6f4   : > { %5300 = vmatmul.mubr.f32.vlgmr.msra.gmra.mxu1 %v5062_v2  ;;  %v3823_v2 = vadd.f32 %v7130_v6, %v3749_v11 }
 0x6f5   : > { %5417 = vmatpush1.msra.mxu1 %v5025_v51  ;;  %5450 = vmatprep.mubr.f32.mxu1 %v7631_v10 }
 0x6f8   : > { %5452 = vmatmul.mubr.f32.vlgmr.msra.gmra.mxu1 %v7340_v16 }
 0x78d   : > { %v4496_v54 = vpop.f32.mrf.mxu0 }
 0x78e   : > { %v4497_v12 = vadd.f32 %v4496_v54, %v4404_v35 }
 0x78f   : > { %v4498_v27 = vpop.f32.mrf.mxu0 }
 0x790   : > { %v4499_v58 = vadd.f32 %v4498_v27, %v4404_v35 }
 0x796   : > { %v4618_v60 = vpop.f32.mrf.mxu1 }
 0x797   : > { %v4619_v18 = vadd.f32 %v4618_v60, %v4497_v12 }
 0x798   : > { %v4711_v29 = vpop.f32.mrf.mxu0  ;;  %v4620_v25 = vpop.f32.mrf.mxu1 }
 0x799   : > { %v4621_v8 = vadd.f32 %v4620_v25, %v4499_v58  ;;  %v4712_v13 = vadd.f32 %v4711_v29, %v4619_v18 }
 0x79a   : > { %v4713_v1 = vpop.f32.mrf.mxu0 }
 0x79b   : > { %v4714_v38 = vadd.f32 %v4713_v1, %v4621_v8 }
 0x7a0   : > { %v4795_v26 = vpop.f32.mrf.mxu1 }
 0x7a1   : > { %v4796_v49 = vadd.f32 %v4795_v26, %v4712_v13 }
 0x7a2   : > { %v4797_v3 = vpop.f32.mrf.mxu1 }
 0x7a3   : > { %v4897_v9 = vpop.f32.mrf.mxu0  ;;  %v4798_v19 = vadd.f32 %v4797_v3, %v4714_v38 }
 0x7a4   : > { %v4898_v45 = vadd.f32 %v4897_v9, %v4796_v49 }
 0x7a5   : > { %v4899_v30 = vpop.f32.mrf.mxu0 }
 0x7a6   : > { %v4900_v52 = vadd.f32 %v4899_v30, %v4798_v19 }
 0x7a8   : > { %v5066_v0 = vpop.f32.mrf.mxu0 }
 0x7a9   : > { %v5067_v31 = vadd.f32 %v5066_v0, %v4988_v24 }
 0x7aa   : > { %v5068_v10 = vpop.f32.mrf.mxu0 }
 0x7ab   : > { %v5069_v22 = vadd.f32 %v5068_v10, %v4988_v24 }
 0x7ac   : > { %v4979_v43 = vpop.f32.mrf.mxu1 }
 0x7ad   : > { %v4980_v20 = vadd.f32 %v4979_v43, %v4898_v45 }
 0x7ae   : > { %v4981_v23 = vpop.f32.mrf.mxu1  ;;  %v5225_v33 = vpop.f32.mrf.mxu0 }
 0x7af   : > { %v4982_v47 = vadd.f32 %v4981_v23, %v4900_v52  ;;  %v4984_v50 = vmax.f32 %v4980_v20, 0.0 }
 0x7b0   : > { %v5148_v17 = vpop.f32.mrf.mxu1  ;;  %v5227_v41 = vpop.f32.mrf.mxu0 }
 0x7b1   : > { %v5149_v32 = vadd.f32 %v5148_v17, %v5067_v31  ;;  %v4985_v61 = vmax.f32 %v4982_v47, 0.0  ;;  %v5458_v40 = vmul.f32 %v4984_v50, %v7117_v53 }
 0x7b2   : > { %v5150_v36 = vpop.f32.mrf.mxu1  ;;  %v5379_v21 = vpop.f32.mrf.mxu0 }
 0x7b3   : > { %v5151_v62 = vadd.f32 %v5150_v36, %v5069_v22  ;;  %v5226_v15 = vadd.f32 %v5225_v33, %v5149_v32  ;;  %v5459_v59 = vmul.f32 %v4985_v61, %v3823_v2 }
 0x7b4   : > { %v5301_v56 = vpop.f32.mrf.mxu1  ;;  %v5381_v28 = vpop.f32.mrf.mxu0 }
 0x7b5   : > { %v5228_v57 = vadd.f32 %v5227_v41, %v5151_v62  ;;  %v5302_v7 = vadd.f32 %v5301_v56, %v5226_v15 }
 0x7b6   : > { %v5303_v48 = vpop.f32.mrf.mxu1 }
 0x7b7   : > { %v5304_v16 = vadd.f32 %v5303_v48, %v5228_v57  ;;  %v5380_v37 = vadd.f32 %v5379_v21, %v5302_v7 }
 0x7b8   : > { %v5453_v51 = vpop.f32.mrf.mxu1 }
 0x7b9   : > { %v5382_v63 = vadd.f32 %v5381_v28, %v5304_v16  ;;  %v5454_v42 = vadd.f32 %v5453_v51, %v5380_v37 }
 0x7ba   : > { %v5455_v34 = vpop.f32.mrf.mxu1 }
 0x7bb   : > { %v5456_v46 = vadd.f32 %v5455_v34, %v5382_v63  ;;  %v5460_v44 = vadd.f32 %v5458_v40, %v5454_v42 }
 0x7bd   : > { %v5461_v5 = vadd.f32 %v5459_v59, %v5456_v46 }
 0x7bf   : > { %v5464_v39 = vcombine.low %v5460_v44, %v5461_v5 }
 0x7c1   : > { %5466 = vst [vmem:[%s340_s29] sm:$0xff] %v5464_v39 }
 0x7c2   : > { %5942 = shalt.err (!%p5939_p3)
}
 0x7c3   : > { %s5943_s27 = scalar_lea.hbm %s5480_s14, 128  ;;  %s5947_s29 = scalar_lea.hbm %s7461_s9, 256 }
 0x7c4   : > { %p5944_p4 = scmp.ne.s32.totalorder %s5480_s14, %s5943_s27  ;;  %p5948_p9 = scmp.lt.s32.totalorder %s5480_s14, %s7461_s9 }
 0x7c5   : > { %p5949_p10 = scmp.lt.s32.totalorder %s5947_s29, %s5943_s27 }
 0x7c6   : > { %p5945_p7 = pnand %p5944_p4, %p6095_p5 }
 0x7c7   : > { %p5950_p11 = por %p5949_p10, %p5948_p9 }
 0x7c8   : > { %p5946_p8 = pneg %p5945_p7 }
 0x7ca   : > { %p5951_p12 = pnand %p5950_p11, %p5946_p8 }
 0x7cc   : > { %5954 = shalt.err (!%p5951_p12)
}
 0x7cd   : > { %5864 = dma.vmem_to_hbm [thread:$0]  (%p6095_p5), %s5483_s23, 128, %s5480_s14, %s5468_s21  }
 0x7ce PF: > { %p5870_p13 = scmp.ge.s32.totalorder %s5989_s12, 2  ;;  %s5494_s17 = sand.u32 1, %s5977_s30  }
 0x7cf   : > { %s5495_s22 = scalar_lea.sflag [#allocation3], %s5494_s17 }
 0x7d0   : > { %p5867_p0 = pnand %p5870_p13, %p6099_p6 }
 0x7d2   : > { %p5868_p1 = pneg %p5867_p0 }
 0x7d4   : > { %5972 = dma.done.wait (%p5868_p1), %s5495_s22, 128  }
 0x7d5   : > { %5974 = vsyncadd (%p5868_p1), %s5495_s22, 4294967168  ;;  %p19_p2 = scmp.ge.s32.totalorder %s6082_s15, 4   ;;  %s7643_s30 = smov %s5981_s10 }
 0x7d6   : > { %s7644_s10 = smov %s5985_s11  ;;  %s7645_s11 = smov %s6093_s18 }
 0x7d7   : > { %s7646_s12 = smov %s6082_s15  ;;  %21 = sbr.rel (!%p19_p2) target bundleno = 3 (0x3), region = 94 }
 0x7dc   :  { %5500 = vsyncpa [#allocation3], 1 }
 0x7dd   :  { %5502 = vsyncpa [#allocation3 + $0x1], 1 }

</bundles_post_ra>
